<compile_context>
chip_gen: v6e
topology: v6e:2x2x1
jax: 0.10.0
libtpu: 0.0.40
codegen_flags: <defaults>
</compile_context>

<pallas_src>
import functools

import jax
import jax.numpy as jnp
from jax.experimental import pallas as pl
from jax.experimental.pallas import tpu as pltpu

LN_EPS = 1e-5


def _layer_norm_f32(x, gamma, beta):
    mu = jnp.mean(x, axis=-1, keepdims=True)
    var = jnp.mean((x - mu) ** 2, axis=-1, keepdims=True)
    return (x - mu) * jax.lax.rsqrt(var + LN_EPS) * gamma + beta


def transformer_kernel(nhead,
                       x_ref, mask_ref,
                       wq_ref, bq_ref, wk_ref, bk_ref, wv_ref, bv_ref,
                       wo_ref, bo_ref,
                       w1_ref, b1_ref, w2_ref, b2_ref,
                       g1_ref, bta1_ref, g2_ref, bta2_ref,
                       out_ref,
                       xb_ref, oacc_ref):
    Bt, S, D = x_ref.shape
    H = nhead
    hd = D // H
    scale = 1.0 / float(hd) ** 0.5
    bf16 = jnp.bfloat16

    # bf16 copy of the activations for the MXU (cast once; the f32 input tile stays in
    # VMEM via the pipeline and is re-read later for the residual).
    xb_ref[...] = x_ref[...].reshape(Bt * S, D).astype(bf16)
    oacc_ref[...] = jnp.zeros_like(oacc_ref)

    # ---- multi-head attention, one head per loop step.
    # Per-head weights are read by dynamic first-axis indexing of the head-major weight
    # refs, so q/k/v/ctx never need a (0,2,1,3) relayout.  The out-projection is fused
    # into the loop as an accumulation, so no per-head context is kept alive.
    @pl.loop(0, H)
    def _attention_head(h):
        xb = xb_ref[...]
        q = (jnp.dot(xb, wq_ref[h], preferred_element_type=jnp.float32)
             + bq_ref[h]) * scale                                    # (Bt*S, hd)
        k = jnp.dot(xb, wk_ref[h], preferred_element_type=jnp.float32) + bk_ref[h]
        v = jnp.dot(xb, wv_ref[h], preferred_element_type=jnp.float32) + bv_ref[h]
        q3 = q.astype(bf16).reshape(Bt, S, hd)
        k3 = k.astype(bf16).reshape(Bt, S, hd)
        v3 = v.astype(bf16).reshape(Bt, S, hd)

        s = jnp.einsum('bqd,bkd->bqk', q3, k3,
                       preferred_element_type=jnp.float32)           # (Bt, S, S)
        # mask: 1 = attend, 0 = exclude; applied per head, no H-fold broadcast buffer.
        s = jnp.where(mask_ref[...] > 0.0, s, -1e9)
        m = jnp.max(s, axis=-1, keepdims=True)
        p = jnp.exp(s - m)
        l = jnp.sum(p, axis=-1, keepdims=True)
        p = p * (1.0 / l)               # exact reciprocal: denominator is only Bt*S elems
        ctx = jnp.einsum('bqk,bkd->bqd', p.astype(bf16), v3,
                         preferred_element_type=jnp.float32)         # (Bt, S, hd)
        oacc_ref[...] += jnp.dot(ctx.reshape(Bt * S, hd).astype(bf16), wo_ref[h],
                                 preferred_element_type=jnp.float32)

    x = x_ref[...].reshape(Bt * S, D)                                # f32 residual
    src2 = oacc_ref[...] + bo_ref[...]

    # ---- residual + norm1 (dropout1 = identity in eval), f32 statistics
    src = _layer_norm_f32(x + src2, g1_ref[...], bta1_ref[...])

    # ---- feedforward: linear2(relu(linear1(src))), bf16 matmul inputs
    h1 = jnp.dot(src.astype(bf16), w1_ref[...],
                 preferred_element_type=jnp.float32) + b1_ref[...]
    h1 = jnp.maximum(h1, 0.0).astype(bf16)
    src2 = jnp.dot(h1, w2_ref[...], preferred_element_type=jnp.float32) + b2_ref[...]

    # ---- residual + norm2 (dropout2 = identity in eval)
    src = _layer_norm_f32(src + src2, g2_ref[...], bta2_ref[...])
    out_ref[...] = src.reshape(Bt, S, D).astype(out_ref.dtype)


def prepare_params(params, nhead):
    """One-time conversion (call at init, not per forward): bf16 matmul weights,
    attention weights re-packed head-major so the kernel indexes one head per step."""
    bf16 = jnp.bfloat16
    D = params["wq"].shape[0]
    F = params["w1"].shape[1]
    hd = D // nhead

    def qkv_w(w):       # (D, H*hd) -> (H, D, hd)
        return jnp.asarray(w, bf16).reshape(D, nhead, hd).transpose(1, 0, 2)

    def qkv_b(b):       # (1, H*hd) -> (H, 1, hd)
        return jnp.asarray(b, jnp.float32).reshape(nhead, hd)[:, None, :]

    return {
        "wq": qkv_w(params["wq"]), "bq": qkv_b(params["bq"]),
        "wk": qkv_w(params["wk"]), "bk": qkv_b(params["bk"]),
        "wv": qkv_w(params["wv"]), "bv": qkv_b(params["bv"]),
        "wo": jnp.asarray(params["wo"], bf16).reshape(nhead, hd, D),
        "bo": jnp.asarray(params["bo"], jnp.float32).reshape(1, D),
        "w1": jnp.asarray(params["w1"], bf16),
        "b1": jnp.asarray(params["b1"], jnp.float32).reshape(1, F),
        "w2": jnp.asarray(params["w2"], bf16),
        "b2": jnp.asarray(params["b2"], jnp.float32).reshape(1, D),
        "g1": jnp.asarray(params["g1"], jnp.float32).reshape(1, D),
        "beta1": jnp.asarray(params["beta1"], jnp.float32).reshape(1, D),
        "g2": jnp.asarray(params["g2"], jnp.float32).reshape(1, D),
        "beta2": jnp.asarray(params["beta2"], jnp.float32).reshape(1, D),
    }


def _device_vmem_config():
    """(vmem_limit_bytes, per-tile budget, preferred minimum grid steps)."""
    try:
        kind = jax.devices()[0].device_kind.lower()
    except Exception:
        kind = ""
    if "v5" in kind or "v6" in kind:
        # single TensorCore, 128 MiB physical VMEM: one big grid step is best
        return 100 << 20, 80 << 20, 1
    if "v2" in kind or "v3" in kind or "v4" in kind:
        return 100 << 20, 80 << 20, 2
    # v7x / unknown: 64 MiB VMEM, 2 TensorCores share the grid -> keep >=2 parallel steps
    return 48 << 20, 36 << 20, 2


def _estimate_tile_vmem_bytes(bt, S, D, F, hd, out_itemsize):
    act = bt * S * D
    attn = bt * S * S
    head = bt * S * hd
    weights = (4 * D * D + 2 * D * F) * 2 + (8 * D + F) * 4      # bf16 weights + f32 bias/LN
    pipelined = 2 * act * 4 + 2 * act * out_itemsize + 2 * attn * 4  # x / out / mask (dbl-buffered)
    scratch = act * (2 + 4)                                      # xb (bf16) + out-proj acc (f32)
    attn_loop = head * (3 * 4 + 3 * 2 + 4) + 2 * attn * 4        # one head of q/k/v/ctx + scores/p
    ffn = bt * S * F * (4 + 2) + 2 * act * 4                     # h1 f32+bf16, src/residual f32
    return weights + pipelined + scratch + attn_loop + ffn


def _pick_batch_tile(B, S, D, F, hd, out_itemsize, budget, min_steps):
    divisors = [d for d in range(B, 0, -1) if B % d == 0]
    want_steps = min(min_steps, B)
    for need_steps in (True, False):
        for bt in divisors:
            if need_steps and B // bt < want_steps:
                continue
            if _estimate_tile_vmem_bytes(bt, S, D, F, hd, out_itemsize) <= budget:
                return bt
    return 1


def transformer_forward(x, mask, params, nhead, *, batch_tile=None, out_dtype=None):
    """params must come from prepare_params (bf16 weights, head-major attention layout)."""
    B, S, D = x.shape
    F = params["w1"].shape[1]
    assert D % nhead == 0
    hd = D // nhead
    out_dtype = out_dtype or x.dtype      # pass jnp.bfloat16 to halve the output writeback
    out_itemsize = jnp.dtype(out_dtype).itemsize

    vmem_limit, budget, min_steps = _device_vmem_config()
    bt = batch_tile or _pick_batch_tile(B, S, D, F, hd, out_itemsize, budget, min_steps)
    assert B % bt == 0

    flops = 2 * B * S * D * (4 * D + 2 * F) + 4 * B * S * S * D
    transcendentals = B * nhead * S * S + 4 * B * S
    bytes_accessed = (B * S * D * (4 + out_itemsize) + B * S * S * 4
                      + (4 * D * D + 2 * D * F) * 2 + (8 * D + F) * 4)
    cost = pl.CostEstimate(flops=int(flops), transcendentals=int(transcendentals),
                           bytes_accessed=int(bytes_accessed))

    mask_f32 = mask.astype(jnp.float32)   # keep full precision for the >0 test
    args = (x, mask_f32,
            params["wq"], params["bq"], params["wk"], params["bk"],
            params["wv"], params["bv"], params["wo"], params["bo"],
            params["w1"], params["b1"], params["w2"], params["b2"],
            params["g1"], params["beta1"], params["g2"], params["beta2"])

    def build(single_buffer_weights):
        const_kwargs = ({"pipeline_mode": pl.Buffered(1)} if single_buffer_weights else {})

        def const_spec(shape):            # grid-invariant operand (weights / biases / LN)
            n = len(shape)
            return pl.BlockSpec(shape, lambda b: (0,) * n, **const_kwargs)

        return pl.pallas_call(
            functools.partial(transformer_kernel, nhead),
            out_shape=jax.ShapeDtypeStruct((B, S, D), out_dtype),
            grid=(B // bt,),
            in_specs=[
                pl.BlockSpec((bt, S, D), lambda b: (b, 0, 0)),            # src (f32)
                pl.BlockSpec((bt, S, S), lambda b: (b, 0, 0)),            # mask (f32)
                const_spec((nhead, D, hd)), const_spec((nhead, 1, hd)),   # wq, bq
                const_spec((nhead, D, hd)), const_spec((nhead, 1, hd)),   # wk, bk
                const_spec((nhead, D, hd)), const_spec((nhead, 1, hd)),   # wv, bv
                const_spec((nhead, hd, D)), const_spec((1, D)),           # wo, bo
                const_spec((D, F)), const_spec((1, F)),                   # w1, b1
                const_spec((F, D)), const_spec((1, D)),                   # w2, b2
                const_spec((1, D)), const_spec((1, D)),                   # norm1 gamma, beta
                const_spec((1, D)), const_spec((1, D)),                   # norm2 gamma, beta
            ],
            out_specs=pl.BlockSpec((bt, S, D), lambda b: (b, 0, 0)),
            scratch_shapes=[
                pltpu.VMEM((bt * S, D), jnp.bfloat16),   # bf16 activations for the MXU
                pltpu.VMEM((bt * S, D), jnp.float32),    # fused out-projection accumulator
            ],
            compiler_params=pltpu.CompilerParams(
                dimension_semantics=("parallel",),
                vmem_limit_bytes=vmem_limit),
            cost_estimate=cost,
        )

    try:
        return jax.block_until_ready(build(True)(*args))
    except Exception:
        # TODO(synk): drop this fallback once single-buffered grid-invariant operands
        # (pl.Buffered(1)) are guaranteed by the minimum supported jax version.
        return build(False)(*args)


def reference_forward(x, mask, params, nhead):
    """Pure-JAX f32 reference of the same forward pass (for validation)."""
    B, S, D = x.shape
    hd = D // nhead
    q = x @ params["wq"] + params["bq"]
    k = x @ params["wk"] + params["bk"]
    v = x @ params["wv"] + params["bv"]
    qh = q.reshape(B, S, nhead, hd).transpose(0, 2, 1, 3)
    kh = k.reshape(B, S, nhead, hd).transpose(0, 2, 1, 3)
    vh = v.reshape(B, S, nhead, hd).transpose(0, 2, 1, 3)
    scores = jnp.einsum("bhqd,bhkd->bhqk", qh, kh) / jnp.sqrt(float(hd))
    scores = jnp.where(mask[:, None, :, :] > 0, scores, -1e9)
    p = jax.nn.softmax(scores, axis=-1)
    attn = jnp.einsum("bhqk,bhkd->bhqd", p, vh).transpose(0, 2, 1, 3).reshape(B, S, D)
    src2 = attn @ params["wo"] + params["bo"]
    src = x + src2

    def ln(y, g, b):
        mu = jnp.mean(y, axis=-1, keepdims=True)
        var = jnp.mean((y - mu) ** 2, axis=-1, keepdims=True)
        return (y - mu) / jnp.sqrt(var + LN_EPS) * g + b

    src = ln(src, params["g1"], params["beta1"])
    h1 = jnp.maximum(src @ params["w1"] + params["b1"], 0.0)
    src2 = h1 @ params["w2"] + params["b2"]
    src = src + src2
    src = ln(src, params["g2"], params["beta2"])
    return src


if __name__ == "__main__":
    # TODO(synk): return_weights / learned_residual paths (defaults off) are not implemented.
    # NOTE: real configs should keep D and head_dim multiples of 128 (lane-dense stores,
    # full MXU feed); this tiny shape is only a correctness check.
    B, S, D, H, Fdim = 2, 8, 32, 4, 64
    key = jax.random.PRNGKey(0)
    ks = jax.random.split(key, 16)

    def w(k, shape, s=0.05):
        return jax.random.normal(k, shape, jnp.float32) * s

    params = {
        "wq": w(ks[0], (D, D)), "bq": w(ks[1], (1, D)),
        "wk": w(ks[2], (D, D)), "bk": w(ks[3], (1, D)),
        "wv": w(ks[4], (D, D)), "bv": w(ks[5], (1, D)),
        "wo": w(ks[6], (D, D)), "bo": w(ks[7], (1, D)),
        "w1": w(ks[8], (D, Fdim)), "b1": w(ks[9], (1, Fdim)),
        "w2": w(ks[10], (Fdim, D)), "b2": w(ks[11], (1, D)),
        "g1": jnp.ones((1, D), jnp.float32), "beta1": jnp.zeros((1, D), jnp.float32),
        "g2": jnp.ones((1, D), jnp.float32), "beta2": jnp.zeros((1, D), jnp.float32),
    }

    x = jax.random.normal(ks[12], (B, S, D), jnp.float32)
    # default mask in the PyTorch forward: all ones (attend to everything)
    mask = jnp.ones((B, S, S), jnp.float32)

    prepared = prepare_params(params, H)     # one-time bf16 / head-major conversion

    out = transformer_forward(x, mask, prepared, H)
    out = jax.block_until_ready(out)

    ref = reference_forward(x, mask, params, H)
    assert out.shape == (B, S, D)
    # bf16 matmul inputs -> loosened tolerance vs the f32 reference
    assert jnp.allclose(out, ref, atol=5e-2, rtol=5e-2), "mismatch vs reference"

    print("KERNEL_OK")
</pallas_src>

<mosaic_0001>
module attributes {stable_mosaic.version = 11 : i64} {
  func.func @transformer_kernel(%arg0: i32, %arg1: memref<1x8x32xf32, #tpu.memory_space<vmem>>, %arg2: memref<1x8x8xf32, #tpu.memory_space<vmem>>, %arg3: memref<4x32x8xbf16, #tpu.memory_space<vmem>>, %arg4: memref<4x1x8xf32, #tpu.memory_space<vmem>>, %arg5: memref<4x32x8xbf16, #tpu.memory_space<vmem>>, %arg6: memref<4x1x8xf32, #tpu.memory_space<vmem>>, %arg7: memref<4x32x8xbf16, #tpu.memory_space<vmem>>, %arg8: memref<4x1x8xf32, #tpu.memory_space<vmem>>, %arg9: memref<4x8x32xbf16, #tpu.memory_space<vmem>>, %arg10: memref<1x32xf32, #tpu.memory_space<vmem>>, %arg11: memref<32x64xbf16, #tpu.memory_space<vmem>>, %arg12: memref<1x64xf32, #tpu.memory_space<vmem>>, %arg13: memref<64x32xbf16, #tpu.memory_space<vmem>>, %arg14: memref<1x32xf32, #tpu.memory_space<vmem>>, %arg15: memref<1x32xf32, #tpu.memory_space<vmem>>, %arg16: memref<1x32xf32, #tpu.memory_space<vmem>>, %arg17: memref<1x32xf32, #tpu.memory_space<vmem>>, %arg18: memref<1x32xf32, #tpu.memory_space<vmem>>, %arg19: memref<1x8x32xf32, #tpu.memory_space<vmem>>, %arg20: memref<8x32xbf16, #tpu.memory_space<vmem>>, %arg21: memref<8x32xf32, #tpu.memory_space<vmem>>) attributes {dimension_semantics = [#tpu.dimension_semantics<parallel>], iteration_bounds = array<i64: 2>, scalar_prefetch = 0 : i64, scratch_operands = 2 : i64, tpu.core_type = #tpu.core_type<tc>, window_params = [{transform_indices = @transform_0, window_bounds = array<i64: 1, 8, 32>}, {transform_indices = @transform_1, window_bounds = array<i64: 1, 8, 8>}, {pipeline_mode = #tpu.pipeline_mode<synchronous>, transform_indices = @transform_2, window_bounds = array<i64: 4, 32, 8>}, {pipeline_mode = #tpu.pipeline_mode<synchronous>, transform_indices = @transform_3, window_bounds = array<i64: 4, 1, 8>}, {pipeline_mode = #tpu.pipeline_mode<synchronous>, transform_indices = @transform_4, window_bounds = array<i64: 4, 32, 8>}, {pipeline_mode = #tpu.pipeline_mode<synchronous>, transform_indices = @transform_5, window_bounds = array<i64: 4, 1, 8>}, {pipeline_mode = #tpu.pipeline_mode<synchronous>, transform_indices = @transform_6, window_bounds = array<i64: 4, 32, 8>}, {pipeline_mode = #tpu.pipeline_mode<synchronous>, transform_indices = @transform_7, window_bounds = array<i64: 4, 1, 8>}, {pipeline_mode = #tpu.pipeline_mode<synchronous>, transform_indices = @transform_8, window_bounds = array<i64: 4, 8, 32>}, {pipeline_mode = #tpu.pipeline_mode<synchronous>, transform_indices = @transform_9, window_bounds = array<i64: 1, 32>}, {pipeline_mode = #tpu.pipeline_mode<synchronous>, transform_indices = @transform_10, window_bounds = array<i64: 32, 64>}, {pipeline_mode = #tpu.pipeline_mode<synchronous>, transform_indices = @transform_11, window_bounds = array<i64: 1, 64>}, {pipeline_mode = #tpu.pipeline_mode<synchronous>, transform_indices = @transform_12, window_bounds = array<i64: 64, 32>}, {pipeline_mode = #tpu.pipeline_mode<synchronous>, transform_indices = @transform_13, window_bounds = array<i64: 1, 32>}, {pipeline_mode = #tpu.pipeline_mode<synchronous>, transform_indices = @transform_14, window_bounds = array<i64: 1, 32>}, {pipeline_mode = #tpu.pipeline_mode<synchronous>, transform_indices = @transform_15, window_bounds = array<i64: 1, 32>}, {pipeline_mode = #tpu.pipeline_mode<synchronous>, transform_indices = @transform_16, window_bounds = array<i64: 1, 32>}, {pipeline_mode = #tpu.pipeline_mode<synchronous>, transform_indices = @transform_17, window_bounds = array<i64: 1, 32>}, {transform_indices = @transform_18, window_bounds = array<i64: 1, 8, 32>}]} {
    %c0 = arith.constant 0 : index
    %c0_0 = arith.constant 0 : index
    %c0_1 = arith.constant 0 : index
    %0 = vector.load %arg1[%c0, %c0_0, %c0_1] : memref<1x8x32xf32, #tpu.memory_space<vmem>>, vector<1x8x32xf32>
    %1 = vector.shape_cast %0 : vector<1x8x32xf32> to vector<8x32xf32>
    %2 = arith.truncf %1 : vector<8x32xf32> to vector<8x32xbf16>
    %c0_2 = arith.constant 0 : index
    %c0_3 = arith.constant 0 : index
    %3 = vector.load %arg20[%c0_2, %c0_3] : memref<8x32xbf16, #tpu.memory_space<vmem>>, vector<8x32xbf16>
    tpu.vector_store %arg20[%c0_2, %c0_3], %2 {strides = array<i32>} : memref<8x32xbf16, #tpu.memory_space<vmem>>, vector<8x32xbf16>,
    %cst = arith.constant 0.000000e+00 : f32
    %4 = vector.broadcast %cst : f32 to vector<8x32xf32>
    %c0_4 = arith.constant 0 : index
    %c0_5 = arith.constant 0 : index
    %5 = vector.load %arg21[%c0_4, %c0_5] : memref<8x32xf32, #tpu.memory_space<vmem>>, vector<8x32xf32>
    tpu.vector_store %arg21[%c0_4, %c0_5], %4 {strides = array<i32>} : memref<8x32xf32, #tpu.memory_space<vmem>>, vector<8x32xf32>,
    %c0_i32 = arith.constant 0 : i32
    %c4_i32 = arith.constant 4 : i32
    %6 = arith.addi %c0_i32, %c4_i32 : i32
    %c1_i32 = arith.constant 1 : i32
    scf.for %arg22 = %c0_i32 to %6 step %c1_i32  : i32 {
      %c1_i32_46 = arith.constant 1 : i32
      %79 = arith.muli %arg22, %c1_i32_46 : i32
      %c0_i32_47 = arith.constant 0 : i32
      %80 = arith.addi %c0_i32_47, %79 : i32
      %c0_48 = arith.constant 0 : index
      %c0_49 = arith.constant 0 : index
      %81 = vector.load %arg20[%c0_48, %c0_49] : memref<8x32xbf16, #tpu.memory_space<vmem>>, vector<8x32xbf16>
      %82 = arith.index_cast %80 : i32 to index
      %c0_50 = arith.constant 0 : index
      %c0_51 = arith.constant 0 : index
      %83 = vector.load %arg3[%82, %c0_50, %c0_51] : memref<4x32x8xbf16, #tpu.memory_space<vmem>>, vector<1x32x8xbf16>
      %84 = vector.shape_cast %83 : vector<1x32x8xbf16> to vector<32x8xbf16>
      %cst_52 = arith.constant dense<0.000000e+00> : vector<8x8xf32>
      %85 = tpu.matmul %81, %84, %cst_52 {dimension_numbers = #tpu.dot_dimension_numbers<[1], [0], [0], [1], [0, 0, 1, 1], [], []>} : vector<8x32xbf16>, vector<32x8xbf16>, vector<8x8xf32> -> vector<8x8xf32>
      %86 = arith.index_cast %80 : i32 to index
      %c0_53 = arith.constant 0 : index
      %c0_54 = arith.constant 0 : index
      %87 = vector.load %arg4[%86, %c0_53, %c0_54] : memref<4x1x8xf32, #tpu.memory_space<vmem>>, vector<1x1x8xf32>
      %88 = vector.shape_cast %87 : vector<1x1x8xf32> to vector<1x8xf32>
      %89 = vector.broadcast %88 : vector<1x8xf32> to vector<8x8xf32>
      %90 = arith.addf %85, %89 : vector<8x8xf32>
      %cst_55 = arith.constant 0.353553385 : f32
      %91 = vector.broadcast %cst_55 : f32 to vector<8x8xf32>
      %92 = arith.mulf %90, %91 : vector<8x8xf32>
      %93 = arith.index_cast %80 : i32 to index
      %c0_56 = arith.constant 0 : index
      %c0_57 = arith.constant 0 : index
      %94 = vector.load %arg5[%93, %c0_56, %c0_57] : memref<4x32x8xbf16, #tpu.memory_space<vmem>>, vector<1x32x8xbf16>
      %95 = vector.shape_cast %94 : vector<1x32x8xbf16> to vector<32x8xbf16>
      %cst_58 = arith.constant dense<0.000000e+00> : vector<8x8xf32>
      %96 = tpu.matmul %81, %95, %cst_58 {dimension_numbers = #tpu.dot_dimension_numbers<[1], [0], [0], [1], [0, 0, 1, 1], [], []>} : vector<8x32xbf16>, vector<32x8xbf16>, vector<8x8xf32> -> vector<8x8xf32>
      %97 = arith.index_cast %80 : i32 to index
      %c0_59 = arith.constant 0 : index
      %c0_60 = arith.constant 0 : index
      %98 = vector.load %arg6[%97, %c0_59, %c0_60] : memref<4x1x8xf32, #tpu.memory_space<vmem>>, vector<1x1x8xf32>
      %99 = vector.shape_cast %98 : vector<1x1x8xf32> to vector<1x8xf32>
      %100 = vector.broadcast %99 : vector<1x8xf32> to vector<8x8xf32>
      %101 = arith.addf %96, %100 : vector<8x8xf32>
      %102 = arith.index_cast %80 : i32 to index
      %c0_61 = arith.constant 0 : index
      %c0_62 = arith.constant 0 : index
      %103 = vector.load %arg7[%102, %c0_61, %c0_62] : memref<4x32x8xbf16, #tpu.memory_space<vmem>>, vector<1x32x8xbf16>
      %104 = vector.shape_cast %103 : vector<1x32x8xbf16> to vector<32x8xbf16>
      %cst_63 = arith.constant dense<0.000000e+00> : vector<8x8xf32>
      %105 = tpu.matmul %81, %104, %cst_63 {dimension_numbers = #tpu.dot_dimension_numbers<[1], [0], [0], [1], [0, 0, 1, 1], [], []>} : vector<8x32xbf16>, vector<32x8xbf16>, vector<8x8xf32> -> vector<8x8xf32>
      %106 = arith.index_cast %80 : i32 to index
      %c0_64 = arith.constant 0 : index
      %c0_65 = arith.constant 0 : index
      %107 = vector.load %arg8[%106, %c0_64, %c0_65] : memref<4x1x8xf32, #tpu.memory_space<vmem>>, vector<1x1x8xf32>
      %108 = vector.shape_cast %107 : vector<1x1x8xf32> to vector<1x8xf32>
      %109 = vector.broadcast %108 : vector<1x8xf32> to vector<8x8xf32>
      %110 = arith.addf %105, %109 : vector<8x8xf32>
      %111 = arith.truncf %92 : vector<8x8xf32> to vector<8x8xbf16>
      %112 = vector.shape_cast %111 : vector<8x8xbf16> to vector<1x8x8xbf16>
      %113 = arith.truncf %101 : vector<8x8xf32> to vector<8x8xbf16>
      %114 = vector.shape_cast %113 : vector<8x8xbf16> to vector<1x8x8xbf16>
      %115 = arith.truncf %110 : vector<8x8xf32> to vector<8x8xbf16>
      %116 = vector.shape_cast %115 : vector<8x8xbf16> to vector<1x8x8xbf16>
      "tpu.trace_start"() <{level = 10 : i32, message = "bqd,bkd->bqk"}> : () -> ()
      %cst_66 = arith.constant dense<0.000000e+00> : vector<1x8x8xf32>
      %117 = tpu.matmul %112, %114, %cst_66 {dimension_numbers = #tpu.dot_dimension_numbers<[2], [2], [1], [1], [0, 0, 0, 1, 1, 1], [0], [0]>} : vector<1x8x8xbf16>, vector<1x8x8xbf16>, vector<1x8x8xf32> -> vector<1x8x8xf32>
      "tpu.trace_stop"() : () -> ()
      %c0_67 = arith.constant 0 : index
      %c0_68 = arith.constant 0 : index
      %c0_69 = arith.constant 0 : index
      %118 = vector.load %arg2[%c0_67, %c0_68, %c0_69] : memref<1x8x8xf32, #tpu.memory_space<vmem>>, vector<1x8x8xf32>
      %cst_70 = arith.constant 0.000000e+00 : f32
      %119 = vector.broadcast %cst_70 : f32 to vector<1x8x8xf32>
      %120 = arith.cmpf ogt, %118, %119 : vector<1x8x8xf32>
      %cst_71 = arith.constant -1.000000e+09 : f32
      %121 = vector.broadcast %cst_71 : f32 to vector<1x8x8xf32>
      %122 = arith.select %120, %117, %121 : vector<1x8x8xi1>, vector<1x8x8xf32>
      %cst_72 = arith.constant dense<0xFF800000> : vector<1x8xf32>
      %123 = vector.multi_reduction <maximumf>, %122, %cst_72 [2] : vector<1x8x8xf32> to vector<1x8xf32>
      %124 = vector.shape_cast %123 : vector<1x8xf32> to vector<1x8x1xf32>
      %125 = vector.broadcast %124 : vector<1x8x1xf32> to vector<1x8x8xf32>
      %126 = arith.subf %122, %125 : vector<1x8x8xf32>
      %127 = math.exp %126 : vector<1x8x8xf32>
      %cst_73 = arith.constant dense<0.000000e+00> : vector<1x8xf32>
      %128 = vector.multi_reduction <add>, %127, %cst_73 [2] : vector<1x8x8xf32> to vector<1x8xf32>
      %129 = vector.shape_cast %128 : vector<1x8xf32> to vector<1x8x1xf32>
      %cst_74 = arith.constant 1.000000e+00 : f32
      %130 = vector.broadcast %cst_74 : f32 to vector<1x8x1xf32>
      %131 = arith.divf %130, %129 : vector<1x8x1xf32>
      %132 = vector.broadcast %131 : vector<1x8x1xf32> to vector<1x8x8xf32>
      %133 = arith.mulf %127, %132 : vector<1x8x8xf32>
      %134 = arith.truncf %133 : vector<1x8x8xf32> to vector<1x8x8xbf16>
      "tpu.trace_start"() <{level = 10 : i32, message = "bqk,bkd->bqd"}> : () -> ()
      %cst_75 = arith.constant dense<0.000000e+00> : vector<1x8x8xf32>
      %135 = tpu.matmul %134, %116, %cst_75 {dimension_numbers = #tpu.dot_dimension_numbers<[2], [1], [1], [2], [0, 0, 0, 1, 1, 2], [0], [0]>} : vector<1x8x8xbf16>, vector<1x8x8xbf16>, vector<1x8x8xf32> -> vector<1x8x8xf32>
      "tpu.trace_stop"() : () -> ()
      %c0_76 = arith.constant 0 : index
      %c0_77 = arith.constant 0 : index
      %136 = vector.load %arg21[%c0_76, %c0_77] : memref<8x32xf32, #tpu.memory_space<vmem>>, vector<8x32xf32>
      %137 = vector.shape_cast %135 : vector<1x8x8xf32> to vector<8x8xf32>
      %138 = arith.truncf %137 : vector<8x8xf32> to vector<8x8xbf16>
      %139 = arith.index_cast %80 : i32 to index
      %c0_78 = arith.constant 0 : index
      %c0_79 = arith.constant 0 : index
      %140 = vector.load %arg9[%139, %c0_78, %c0_79] : memref<4x8x32xbf16, #tpu.memory_space<vmem>>, vector<1x8x32xbf16>
      %141 = vector.shape_cast %140 : vector<1x8x32xbf16> to vector<8x32xbf16>
      %cst_80 = arith.constant dense<0.000000e+00> : vector<8x32xf32>
      %142 = tpu.matmul %138, %141, %cst_80 {dimension_numbers = #tpu.dot_dimension_numbers<[1], [0], [0], [1], [0, 0, 1, 1], [], []>} : vector<8x8xbf16>, vector<8x32xbf16>, vector<8x32xf32> -> vector<8x32xf32>
      %143 = arith.addf %136, %142 : vector<8x32xf32>
      %c0_81 = arith.constant 0 : index
      %c0_82 = arith.constant 0 : index
      %144 = vector.load %arg21[%c0_81, %c0_82] : memref<8x32xf32, #tpu.memory_space<vmem>>, vector<8x32xf32>
      tpu.vector_store %arg21[%c0_81, %c0_82], %143 {strides = array<i32>} : memref<8x32xf32, #tpu.memory_space<vmem>>, vector<8x32xf32>,
    }
    %c4_i32_6 = arith.constant 4 : i32
    %c0_7 = arith.constant 0 : index
    %c0_8 = arith.constant 0 : index
    %c0_9 = arith.constant 0 : index
    %7 = vector.load %arg1[%c0_7, %c0_8, %c0_9] : memref<1x8x32xf32, #tpu.memory_space<vmem>>, vector<1x8x32xf32>
    %8 = vector.shape_cast %7 : vector<1x8x32xf32> to vector<8x32xf32>
    %c0_10 = arith.constant 0 : index
    %c0_11 = arith.constant 0 : index
    %9 = vector.load %arg21[%c0_10, %c0_11] : memref<8x32xf32, #tpu.memory_space<vmem>>, vector<8x32xf32>
    %c0_12 = arith.constant 0 : index
    %c0_13 = arith.constant 0 : index
    %10 = vector.load %arg10[%c0_12, %c0_13] : memref<1x32xf32, #tpu.memory_space<vmem>>, vector<1x32xf32>
    %11 = vector.broadcast %10 : vector<1x32xf32> to vector<8x32xf32>
    %12 = arith.addf %9, %11 : vector<8x32xf32>
    %13 = arith.addf %8, %12 : vector<8x32xf32>
    %c0_14 = arith.constant 0 : index
    %c0_15 = arith.constant 0 : index
    %14 = vector.load %arg15[%c0_14, %c0_15] : memref<1x32xf32, #tpu.memory_space<vmem>>, vector<1x32xf32>
    %c0_16 = arith.constant 0 : index
    %c0_17 = arith.constant 0 : index
    %15 = vector.load %arg16[%c0_16, %c0_17] : memref<1x32xf32, #tpu.memory_space<vmem>>, vector<1x32xf32>
    %cst_18 = arith.constant dense<0.000000e+00> : vector<8xf32>
    %16 = vector.multi_reduction <add>, %13, %cst_18 [1] : vector<8x32xf32> to vector<8xf32>
    %17 = vector.shape_cast %16 : vector<8xf32> to vector<8x1xf32>
    %cst_19 = arith.constant 3.200000e+01 : f32
    %18 = vector.broadcast %cst_19 : f32 to vector<8x1xf32>
    %19 = arith.divf %17, %18 : vector<8x1xf32>
    %20 = vector.broadcast %19 : vector<8x1xf32> to vector<8x32xf32>
    %21 = arith.subf %13, %20 : vector<8x32xf32>
    %22 = arith.mulf %21, %21 : vector<8x32xf32>
    %cst_20 = arith.constant dense<0.000000e+00> : vector<8xf32>
    %23 = vector.multi_reduction <add>, %22, %cst_20 [1] : vector<8x32xf32> to vector<8xf32>
    %24 = vector.shape_cast %23 : vector<8xf32> to vector<8x1xf32>
    %cst_21 = arith.constant 3.200000e+01 : f32
    %25 = vector.broadcast %cst_21 : f32 to vector<8x1xf32>
    %26 = arith.divf %24, %25 : vector<8x1xf32>
    %27 = vector.broadcast %19 : vector<8x1xf32> to vector<8x32xf32>
    %28 = arith.subf %13, %27 : vector<8x32xf32>
    %cst_22 = arith.constant 9.99999974E-6 : f32
    %29 = vector.broadcast %cst_22 : f32 to vector<8x1xf32>
    %30 = arith.addf %26, %29 : vector<8x1xf32>
    %31 = math.rsqrt %30 : vector<8x1xf32>
    %32 = vector.broadcast %31 : vector<8x1xf32> to vector<8x32xf32>
    %33 = arith.mulf %28, %32 : vector<8x32xf32>
    %34 = vector.broadcast %14 : vector<1x32xf32> to vector<8x32xf32>
    %35 = arith.mulf %33, %34 : vector<8x32xf32>
    %36 = vector.broadcast %15 : vector<1x32xf32> to vector<8x32xf32>
    %37 = arith.addf %35, %36 : vector<8x32xf32>
    %38 = arith.truncf %37 : vector<8x32xf32> to vector<8x32xbf16>
    %c0_23 = arith.constant 0 : index
    %c0_24 = arith.constant 0 : index
    %39 = vector.load %arg11[%c0_23, %c0_24] : memref<32x64xbf16, #tpu.memory_space<vmem>>, vector<32x64xbf16>
    %cst_25 = arith.constant dense<0.000000e+00> : vector<8x64xf32>
    %40 = tpu.matmul %38, %39, %cst_25 {dimension_numbers = #tpu.dot_dimension_numbers<[1], [0], [0], [1], [0, 0, 1, 1], [], []>} : vector<8x32xbf16>, vector<32x64xbf16>, vector<8x64xf32> -> vector<8x64xf32>
    %c0_26 = arith.constant 0 : index
    %c0_27 = arith.constant 0 : index
    %41 = vector.load %arg12[%c0_26, %c0_27] : memref<1x64xf32, #tpu.memory_space<vmem>>, vector<1x64xf32>
    %42 = vector.broadcast %41 : vector<1x64xf32> to vector<8x64xf32>
    %43 = arith.addf %40, %42 : vector<8x64xf32>
    %cst_28 = arith.constant 0.000000e+00 : f32
    %44 = vector.broadcast %cst_28 : f32 to vector<8x64xf32>
    %45 = arith.maximumf %43, %44 : vector<8x64xf32>
    %46 = arith.truncf %45 : vector<8x64xf32> to vector<8x64xbf16>
    %c0_29 = arith.constant 0 : index
    %c0_30 = arith.constant 0 : index
    %47 = vector.load %arg13[%c0_29, %c0_30] : memref<64x32xbf16, #tpu.memory_space<vmem>>, vector<64x32xbf16>
    %cst_31 = arith.constant dense<0.000000e+00> : vector<8x32xf32>
    %48 = tpu.matmul %46, %47, %cst_31 {dimension_numbers = #tpu.dot_dimension_numbers<[1], [0], [0], [1], [0, 0, 1, 1], [], []>} : vector<8x64xbf16>, vector<64x32xbf16>, vector<8x32xf32> -> vector<8x32xf32>
    %c0_32 = arith.constant 0 : index
    %c0_33 = arith.constant 0 : index
    %49 = vector.load %arg14[%c0_32, %c0_33] : memref<1x32xf32, #tpu.memory_space<vmem>>, vector<1x32xf32>
    %50 = vector.broadcast %49 : vector<1x32xf32> to vector<8x32xf32>
    %51 = arith.addf %48, %50 : vector<8x32xf32>
    %52 = arith.addf %37, %51 : vector<8x32xf32>
    %c0_34 = arith.constant 0 : index
    %c0_35 = arith.constant 0 : index
    %53 = vector.load %arg17[%c0_34, %c0_35] : memref<1x32xf32, #tpu.memory_space<vmem>>, vector<1x32xf32>
    %c0_36 = arith.constant 0 : index
    %c0_37 = arith.constant 0 : index
    %54 = vector.load %arg18[%c0_36, %c0_37] : memref<1x32xf32, #tpu.memory_space<vmem>>, vector<1x32xf32>
    %cst_38 = arith.constant dense<0.000000e+00> : vector<8xf32>
    %55 = vector.multi_reduction <add>, %52, %cst_38 [1] : vector<8x32xf32> to vector<8xf32>
    %56 = vector.shape_cast %55 : vector<8xf32> to vector<8x1xf32>
    %cst_39 = arith.constant 3.200000e+01 : f32
    %57 = vector.broadcast %cst_39 : f32 to vector<8x1xf32>
    %58 = arith.divf %56, %57 : vector<8x1xf32>
    %59 = vector.broadcast %58 : vector<8x1xf32> to vector<8x32xf32>
    %60 = arith.subf %52, %59 : vector<8x32xf32>
    %61 = arith.mulf %60, %60 : vector<8x32xf32>
    %cst_40 = arith.constant dense<0.000000e+00> : vector<8xf32>
    %62 = vector.multi_reduction <add>, %61, %cst_40 [1] : vector<8x32xf32> to vector<8xf32>
    %63 = vector.shape_cast %62 : vector<8xf32> to vector<8x1xf32>
    %cst_41 = arith.constant 3.200000e+01 : f32
    %64 = vector.broadcast %cst_41 : f32 to vector<8x1xf32>
    %65 = arith.divf %63, %64 : vector<8x1xf32>
    %66 = vector.broadcast %58 : vector<8x1xf32> to vector<8x32xf32>
    %67 = arith.subf %52, %66 : vector<8x32xf32>
    %cst_42 = arith.constant 9.99999974E-6 : f32
    %68 = vector.broadcast %cst_42 : f32 to vector<8x1xf32>
    %69 = arith.addf %65, %68 : vector<8x1xf32>
    %70 = math.rsqrt %69 : vector<8x1xf32>
    %71 = vector.broadcast %70 : vector<8x1xf32> to vector<8x32xf32>
    %72 = arith.mulf %67, %71 : vector<8x32xf32>
    %73 = vector.broadcast %53 : vector<1x32xf32> to vector<8x32xf32>
    %74 = arith.mulf %72, %73 : vector<8x32xf32>
    %75 = vector.broadcast %54 : vector<1x32xf32> to vector<8x32xf32>
    %76 = arith.addf %74, %75 : vector<8x32xf32>
    %77 = vector.shape_cast %76 : vector<8x32xf32> to vector<1x8x32xf32>
    %c0_43 = arith.constant 0 : index
    %c0_44 = arith.constant 0 : index
    %c0_45 = arith.constant 0 : index
    %78 = vector.load %arg19[%c0_43, %c0_44, %c0_45] : memref<1x8x32xf32, #tpu.memory_space<vmem>>, vector<1x8x32xf32>
    tpu.vector_store %arg19[%c0_43, %c0_44, %c0_45], %77 {strides = array<i32>} : memref<1x8x32xf32, #tpu.memory_space<vmem>>, vector<1x8x32xf32>,
    return
  }
  func.func @transform_0(%arg0: i32) -> (i32, i32, i32) {
    %c0_i32 = arith.constant 0 : i32
    %c0_i32_0 = arith.constant 0 : i32
    %c0_i32_1 = arith.constant 0 : i32
    return %arg0, %c0_i32, %c0_i32_0 : i32, i32, i32
  }
  func.func @transform_1(%arg0: i32) -> (i32, i32, i32) {
    %c0_i32 = arith.constant 0 : i32
    %c0_i32_0 = arith.constant 0 : i32
    %c0_i32_1 = arith.constant 0 : i32
    return %arg0, %c0_i32, %c0_i32_0 : i32, i32, i32
  }
  func.func @transform_2(%arg0: i32) -> (i32, i32, i32) {
    %c0_i32 = arith.constant 0 : i32
    %c0_i32_0 = arith.constant 0 : i32
    %c0_i32_1 = arith.constant 0 : i32
    %c0_i32_2 = arith.constant 0 : i32
    return %c0_i32, %c0_i32_0, %c0_i32_1 : i32, i32, i32
  }
  func.func @transform_3(%arg0: i32) -> (i32, i32, i32) {
    %c0_i32 = arith.constant 0 : i32
    %c0_i32_0 = arith.constant 0 : i32
    %c0_i32_1 = arith.constant 0 : i32
    %c0_i32_2 = arith.constant 0 : i32
    return %c0_i32, %c0_i32_0, %c0_i32_1 : i32, i32, i32
  }
  func.func @transform_4(%arg0: i32) -> (i32, i32, i32) {
    %c0_i32 = arith.constant 0 : i32
    %c0_i32_0 = arith.constant 0 : i32
    %c0_i32_1 = arith.constant 0 : i32
    %c0_i32_2 = arith.constant 0 : i32
    return %c0_i32, %c0_i32_0, %c0_i32_1 : i32, i32, i32
  }
  func.func @transform_5(%arg0: i32) -> (i32, i32, i32) {
    %c0_i32 = arith.constant 0 : i32
    %c0_i32_0 = arith.constant 0 : i32
    %c0_i32_1 = arith.constant 0 : i32
    %c0_i32_2 = arith.constant 0 : i32
    return %c0_i32, %c0_i32_0, %c0_i32_1 : i32, i32, i32
  }
  func.func @transform_6(%arg0: i32) -> (i32, i32, i32) {
    %c0_i32 = arith.constant 0 : i32
    %c0_i32_0 = arith.constant 0 : i32
    %c0_i32_1 = arith.constant 0 : i32
    %c0_i32_2 = arith.constant 0 : i32
    return %c0_i32, %c0_i32_0, %c0_i32_1 : i32, i32, i32
  }
  func.func @transform_7(%arg0: i32) -> (i32, i32, i32) {
    %c0_i32 = arith.constant 0 : i32
    %c0_i32_0 = arith.constant 0 : i32
    %c0_i32_1 = arith.constant 0 : i32
    %c0_i32_2 = arith.constant 0 : i32
    return %c0_i32, %c0_i32_0, %c0_i32_1 : i32, i32, i32
  }
  func.func @transform_8(%arg0: i32) -> (i32, i32, i32) {
    %c0_i32 = arith.constant 0 : i32
    %c0_i32_0 = arith.constant 0 : i32
    %c0_i32_1 = arith.constant 0 : i32
    %c0_i32_2 = arith.constant 0 : i32
    return %c0_i32, %c0_i32_0, %c0_i32_1 : i32, i32, i32
  }
  func.func @transform_9(%arg0: i32) -> (i32, i32) {
    %c0_i32 = arith.constant 0 : i32
    %c0_i32_0 = arith.constant 0 : i32
    %c0_i32_1 = arith.constant 0 : i32
    return %c0_i32, %c0_i32_0 : i32, i32
  }
  func.func @transform_10(%arg0: i32) -> (i32, i32) {
    %c0_i32 = arith.constant 0 : i32
    %c0_i32_0 = arith.constant 0 : i32
    %c0_i32_1 = arith.constant 0 : i32
    return %c0_i32, %c0_i32_0 : i32, i32
  }
  func.func @transform_11(%arg0: i32) -> (i32, i32) {
    %c0_i32 = arith.constant 0 : i32
    %c0_i32_0 = arith.constant 0 : i32
    %c0_i32_1 = arith.constant 0 : i32
    return %c0_i32, %c0_i32_0 : i32, i32
  }
  func.func @transform_12(%arg0: i32) -> (i32, i32) {
    %c0_i32 = arith.constant 0 : i32
    %c0_i32_0 = arith.constant 0 : i32
    %c0_i32_1 = arith.constant 0 : i32
    return %c0_i32, %c0_i32_0 : i32, i32
  }
  func.func @transform_13(%arg0: i32) -> (i32, i32) {
    %c0_i32 = arith.constant 0 : i32
    %c0_i32_0 = arith.constant 0 : i32
    %c0_i32_1 = arith.constant 0 : i32
    return %c0_i32, %c0_i32_0 : i32, i32
  }
  func.func @transform_14(%arg0: i32) -> (i32, i32) {
    %c0_i32 = arith.constant 0 : i32
    %c0_i32_0 = arith.constant 0 : i32
    %c0_i32_1 = arith.constant 0 : i32
    return %c0_i32, %c0_i32_0 : i32, i32
  }
  func.func @transform_15(%arg0: i32) -> (i32, i32) {
    %c0_i32 = arith.constant 0 : i32
    %c0_i32_0 = arith.constant 0 : i32
    %c0_i32_1 = arith.constant 0 : i32
    return %c0_i32, %c0_i32_0 : i32, i32
  }
  func.func @transform_16(%arg0: i32) -> (i32, i32) {
    %c0_i32 = arith.constant 0 : i32
    %c0_i32_0 = arith.constant 0 : i32
    %c0_i32_1 = arith.constant 0 : i32
    return %c0_i32, %c0_i32_0 : i32, i32
  }
  func.func @transform_17(%arg0: i32) -> (i32, i32) {
    %c0_i32 = arith.constant 0 : i32
    %c0_i32_0 = arith.constant 0 : i32
    %c0_i32_1 = arith.constant 0 : i32
    return %c0_i32, %c0_i32_0 : i32, i32
  }
  func.func @transform_18(%arg0: i32) -> (i32, i32, i32) {
    %c0_i32 = arith.constant 0 : i32
    %c0_i32_0 = arith.constant 0 : i32
    %c0_i32_1 = arith.constant 0 : i32
    return %arg0, %c0_i32, %c0_i32_0 : i32, i32, i32
  }
}

module attributes {stable_mosaic.version = 11 : i64} {
  func.func @transformer_kernel(%arg0: i32, %arg1: memref<1x8x32xf32, #tpu.memory_space<vmem>>, %arg2: memref<1x8x8xf32, #tpu.memory_space<vmem>>, %arg3: memref<4x32x8xbf16, #tpu.memory_space<vmem>>, %arg4: memref<4x1x8xf32, #tpu.memory_space<vmem>>, %arg5: memref<4x32x8xbf16, #tpu.memory_space<vmem>>, %arg6: memref<4x1x8xf32, #tpu.memory_space<vmem>>, %arg7: memref<4x32x8xbf16, #tpu.memory_space<vmem>>, %arg8: memref<4x1x8xf32, #tpu.memory_space<vmem>>, %arg9: memref<4x8x32xbf16, #tpu.memory_space<vmem>>, %arg10: memref<1x32xf32, #tpu.memory_space<vmem>>, %arg11: memref<32x64xbf16, #tpu.memory_space<vmem>>, %arg12: memref<1x64xf32, #tpu.memory_space<vmem>>, %arg13: memref<64x32xbf16, #tpu.memory_space<vmem>>, %arg14: memref<1x32xf32, #tpu.memory_space<vmem>>, %arg15: memref<1x32xf32, #tpu.memory_space<vmem>>, %arg16: memref<1x32xf32, #tpu.memory_space<vmem>>, %arg17: memref<1x32xf32, #tpu.memory_space<vmem>>, %arg18: memref<1x32xf32, #tpu.memory_space<vmem>>, %arg19: memref<1x8x32xf32, #tpu.memory_space<vmem>>, %arg20: memref<8x32xbf16, #tpu.memory_space<vmem>>, %arg21: memref<8x32xf32, #tpu.memory_space<vmem>>) attributes {dimension_semantics = [#tpu.dimension_semantics<parallel>], iteration_bounds = array<i64: 2>, scalar_prefetch = 0 : i64, scratch_operands = 2 : i64, tpu.core_type = #tpu.core_type<tc>, window_params = [{transform_indices = @transform_0, window_bounds = array<i64: 1, 8, 32>}, {transform_indices = @transform_1, window_bounds = array<i64: 1, 8, 8>}, {pipeline_mode = #tpu.pipeline_mode<synchronous>, transform_indices = @transform_2, window_bounds = array<i64: 4, 32, 8>}, {pipeline_mode = #tpu.pipeline_mode<synchronous>, transform_indices = @transform_3, window_bounds = array<i64: 4, 1, 8>}, {pipeline_mode = #tpu.pipeline_mode<synchronous>, transform_indices = @transform_4, window_bounds = array<i64: 4, 32, 8>}, {pipeline_mode = #tpu.pipeline_mode<synchronous>, transform_indices = @transform_5, window_bounds = array<i64: 4, 1, 8>}, {pipeline_mode = #tpu.pipeline_mode<synchronous>, transform_indices = @transform_6, window_bounds = array<i64: 4, 32, 8>}, {pipeline_mode = #tpu.pipeline_mode<synchronous>, transform_indices = @transform_7, window_bounds = array<i64: 4, 1, 8>}, {pipeline_mode = #tpu.pipeline_mode<synchronous>, transform_indices = @transform_8, window_bounds = array<i64: 4, 8, 32>}, {pipeline_mode = #tpu.pipeline_mode<synchronous>, transform_indices = @transform_9, window_bounds = array<i64: 1, 32>}, {pipeline_mode = #tpu.pipeline_mode<synchronous>, transform_indices = @transform_10, window_bounds = array<i64: 32, 64>}, {pipeline_mode = #tpu.pipeline_mode<synchronous>, transform_indices = @transform_11, window_bounds = array<i64: 1, 64>}, {pipeline_mode = #tpu.pipeline_mode<synchronous>, transform_indices = @transform_12, window_bounds = array<i64: 64, 32>}, {pipeline_mode = #tpu.pipeline_mode<synchronous>, transform_indices = @transform_13, window_bounds = array<i64: 1, 32>}, {pipeline_mode = #tpu.pipeline_mode<synchronous>, transform_indices = @transform_14, window_bounds = array<i64: 1, 32>}, {pipeline_mode = #tpu.pipeline_mode<synchronous>, transform_indices = @transform_15, window_bounds = array<i64: 1, 32>}, {pipeline_mode = #tpu.pipeline_mode<synchronous>, transform_indices = @transform_16, window_bounds = array<i64: 1, 32>}, {pipeline_mode = #tpu.pipeline_mode<synchronous>, transform_indices = @transform_17, window_bounds = array<i64: 1, 32>}, {transform_indices = @transform_18, window_bounds = array<i64: 1, 8, 32>}]} {
    %c0 = arith.constant 0 : index
    %c0_0 = arith.constant 0 : index
    %c0_1 = arith.constant 0 : index
    %0 = vector.load %arg1[%c0, %c0_0, %c0_1] : memref<1x8x32xf32, #tpu.memory_space<vmem>>, vector<1x8x32xf32>
    %1 = vector.shape_cast %0 : vector<1x8x32xf32> to vector<8x32xf32>
    %2 = arith.truncf %1 : vector<8x32xf32> to vector<8x32xbf16>
    %c0_2 = arith.constant 0 : index
    %c0_3 = arith.constant 0 : index
    %3 = vector.load %arg20[%c0_2, %c0_3] : memref<8x32xbf16, #tpu.memory_space<vmem>>, vector<8x32xbf16>
    tpu.vector_store %arg20[%c0_2, %c0_3], %2 {strides = array<i32>} : memref<8x32xbf16, #tpu.memory_space<vmem>>, vector<8x32xbf16>,
    %cst = arith.constant 0.000000e+00 : f32
    %4 = vector.broadcast %cst : f32 to vector<8x32xf32>
    %c0_4 = arith.constant 0 : index
    %c0_5 = arith.constant 0 : index
    %5 = vector.load %arg21[%c0_4, %c0_5] : memref<8x32xf32, #tpu.memory_space<vmem>>, vector<8x32xf32>
    tpu.vector_store %arg21[%c0_4, %c0_5], %4 {strides = array<i32>} : memref<8x32xf32, #tpu.memory_space<vmem>>, vector<8x32xf32>,
    %c0_i32 = arith.constant 0 : i32
    %c4_i32 = arith.constant 4 : i32
    %6 = arith.addi %c0_i32, %c4_i32 : i32
    %c1_i32 = arith.constant 1 : i32
    scf.for %arg22 = %c0_i32 to %6 step %c1_i32  : i32 {
      %c1_i32_46 = arith.constant 1 : i32
      %79 = arith.muli %arg22, %c1_i32_46 : i32
      %c0_i32_47 = arith.constant 0 : i32
      %80 = arith.addi %c0_i32_47, %79 : i32
      %c0_48 = arith.constant 0 : index
      %c0_49 = arith.constant 0 : index
      %81 = vector.load %arg20[%c0_48, %c0_49] : memref<8x32xbf16, #tpu.memory_space<vmem>>, vector<8x32xbf16>
      %82 = arith.index_cast %80 : i32 to index
      %c0_50 = arith.constant 0 : index
      %c0_51 = arith.constant 0 : index
      %83 = vector.load %arg3[%82, %c0_50, %c0_51] : memref<4x32x8xbf16, #tpu.memory_space<vmem>>, vector<1x32x8xbf16>
      %84 = vector.shape_cast %83 : vector<1x32x8xbf16> to vector<32x8xbf16>
      %cst_52 = arith.constant dense<0.000000e+00> : vector<8x8xf32>
      %85 = tpu.matmul %81, %84, %cst_52 {dimension_numbers = #tpu.dot_dimension_numbers<[1], [0], [0], [1], [0, 0, 1, 1], [], []>} : vector<8x32xbf16>, vector<32x8xbf16>, vector<8x8xf32> -> vector<8x8xf32>
      %86 = arith.index_cast %80 : i32 to index
      %c0_53 = arith.constant 0 : index
      %c0_54 = arith.constant 0 : index
      %87 = vector.load %arg4[%86, %c0_53, %c0_54] : memref<4x1x8xf32, #tpu.memory_space<vmem>>, vector<1x1x8xf32>
      %88 = vector.shape_cast %87 : vector<1x1x8xf32> to vector<1x8xf32>
      %89 = vector.broadcast %88 : vector<1x8xf32> to vector<8x8xf32>
      %90 = arith.addf %85, %89 : vector<8x8xf32>
      %cst_55 = arith.constant 0.353553385 : f32
      %91 = vector.broadcast %cst_55 : f32 to vector<8x8xf32>
      %92 = arith.mulf %90, %91 : vector<8x8xf32>
      %93 = arith.index_cast %80 : i32 to index
      %c0_56 = arith.constant 0 : index
      %c0_57 = arith.constant 0 : index
      %94 = vector.load %arg5[%93, %c0_56, %c0_57] : memref<4x32x8xbf16, #tpu.memory_space<vmem>>, vector<1x32x8xbf16>
      %95 = vector.shape_cast %94 : vector<1x32x8xbf16> to vector<32x8xbf16>
      %cst_58 = arith.constant dense<0.000000e+00> : vector<8x8xf32>
      %96 = tpu.matmul %81, %95, %cst_58 {dimension_numbers = #tpu.dot_dimension_numbers<[1], [0], [0], [1], [0, 0, 1, 1], [], []>} : vector<8x32xbf16>, vector<32x8xbf16>, vector<8x8xf32> -> vector<8x8xf32>
      %97 = arith.index_cast %80 : i32 to index
      %c0_59 = arith.constant 0 : index
      %c0_60 = arith.constant 0 : index
      %98 = vector.load %arg6[%97, %c0_59, %c0_60] : memref<4x1x8xf32, #tpu.memory_space<vmem>>, vector<1x1x8xf32>
      %99 = vector.shape_cast %98 : vector<1x1x8xf32> to vector<1x8xf32>
      %100 = vector.broadcast %99 : vector<1x8xf32> to vector<8x8xf32>
      %101 = arith.addf %96, %100 : vector<8x8xf32>
      %102 = arith.index_cast %80 : i32 to index
      %c0_61 = arith.constant 0 : index
      %c0_62 = arith.constant 0 : index
      %103 = vector.load %arg7[%102, %c0_61, %c0_62] : memref<4x32x8xbf16, #tpu.memory_space<vmem>>, vector<1x32x8xbf16>
      %104 = vector.shape_cast %103 : vector<1x32x8xbf16> to vector<32x8xbf16>
      %cst_63 = arith.constant dense<0.000000e+00> : vector<8x8xf32>
      %105 = tpu.matmul %81, %104, %cst_63 {dimension_numbers = #tpu.dot_dimension_numbers<[1], [0], [0], [1], [0, 0, 1, 1], [], []>} : vector<8x32xbf16>, vector<32x8xbf16>, vector<8x8xf32> -> vector<8x8xf32>
      %106 = arith.index_cast %80 : i32 to index
      %c0_64 = arith.constant 0 : index
      %c0_65 = arith.constant 0 : index
      %107 = vector.load %arg8[%106, %c0_64, %c0_65] : memref<4x1x8xf32, #tpu.memory_space<vmem>>, vector<1x1x8xf32>
      %108 = vector.shape_cast %107 : vector<1x1x8xf32> to vector<1x8xf32>
      %109 = vector.broadcast %108 : vector<1x8xf32> to vector<8x8xf32>
      %110 = arith.addf %105, %109 : vector<8x8xf32>
      %111 = arith.truncf %92 : vector<8x8xf32> to vector<8x8xbf16>
      %112 = vector.shape_cast %111 : vector<8x8xbf16> to vector<1x8x8xbf16>
      %113 = arith.truncf %101 : vector<8x8xf32> to vector<8x8xbf16>
      %114 = vector.shape_cast %113 : vector<8x8xbf16> to vector<1x8x8xbf16>
      %115 = arith.truncf %110 : vector<8x8xf32> to vector<8x8xbf16>
      %116 = vector.shape_cast %115 : vector<8x8xbf16> to vector<1x8x8xbf16>
      "tpu.trace_start"() <{level = 10 : i32, message = "bqd,bkd->bqk"}> : () -> ()
      %cst_66 = arith.constant dense<0.000000e+00> : vector<1x8x8xf32>
      %117 = tpu.matmul %112, %114, %cst_66 {dimension_numbers = #tpu.dot_dimension_numbers<[2], [2], [1], [1], [0, 0, 0, 1, 1, 1], [0], [0]>} : vector<1x8x8xbf16>, vector<1x8x8xbf16>, vector<1x8x8xf32> -> vector<1x8x8xf32>
      "tpu.trace_stop"() : () -> ()
      %c0_67 = arith.constant 0 : index
      %c0_68 = arith.constant 0 : index
      %c0_69 = arith.constant 0 : index
      %118 = vector.load %arg2[%c0_67, %c0_68, %c0_69] : memref<1x8x8xf32, #tpu.memory_space<vmem>>, vector<1x8x8xf32>
      %cst_70 = arith.constant 0.000000e+00 : f32
      %119 = vector.broadcast %cst_70 : f32 to vector<1x8x8xf32>
      %120 = arith.cmpf ogt, %118, %119 : vector<1x8x8xf32>
      %cst_71 = arith.constant -1.000000e+09 : f32
      %121 = vector.broadcast %cst_71 : f32 to vector<1x8x8xf32>
      %122 = arith.select %120, %117, %121 : vector<1x8x8xi1>, vector<1x8x8xf32>
      %cst_72 = arith.constant dense<0xFF800000> : vector<1x8xf32>
      %123 = vector.multi_reduction <maximumf>, %122, %cst_72 [2] : vector<1x8x8xf32> to vector<1x8xf32>
      %124 = vector.shape_cast %123 : vector<1x8xf32> to vector<1x8x1xf32>
      %125 = vector.broadcast %124 : vector<1x8x1xf32> to vector<1x8x8xf32>
      %126 = arith.subf %122, %125 : vector<1x8x8xf32>
      %127 = math.exp %126 : vector<1x8x8xf32>
      %cst_73 = arith.constant dense<0.000000e+00> : vector<1x8xf32>
      %128 = vector.multi_reduction <add>, %127, %cst_73 [2] : vector<1x8x8xf32> to vector<1x8xf32>
      %129 = vector.shape_cast %128 : vector<1x8xf32> to vector<1x8x1xf32>
      %cst_74 = arith.constant 1.000000e+00 : f32
      %130 = vector.broadcast %cst_74 : f32 to vector<1x8x1xf32>
      %131 = arith.divf %130, %129 : vector<1x8x1xf32>
      %132 = vector.broadcast %131 : vector<1x8x1xf32> to vector<1x8x8xf32>
      %133 = arith.mulf %127, %132 : vector<1x8x8xf32>
      %134 = arith.truncf %133 : vector<1x8x8xf32> to vector<1x8x8xbf16>
      "tpu.trace_start"() <{level = 10 : i32, message = "bqk,bkd->bqd"}> : () -> ()
      %cst_75 = arith.constant dense<0.000000e+00> : vector<1x8x8xf32>
      %135 = tpu.matmul %134, %116, %cst_75 {dimension_numbers = #tpu.dot_dimension_numbers<[2], [1], [1], [2], [0, 0, 0, 1, 1, 2], [0], [0]>} : vector<1x8x8xbf16>, vector<1x8x8xbf16>, vector<1x8x8xf32> -> vector<1x8x8xf32>
      "tpu.trace_stop"() : () -> ()
      %c0_76 = arith.constant 0 : index
      %c0_77 = arith.constant 0 : index
      %136 = vector.load %arg21[%c0_76, %c0_77] : memref<8x32xf32, #tpu.memory_space<vmem>>, vector<8x32xf32>
      %137 = vector.shape_cast %135 : vector<1x8x8xf32> to vector<8x8xf32>
      %138 = arith.truncf %137 : vector<8x8xf32> to vector<8x8xbf16>
      %139 = arith.index_cast %80 : i32 to index
      %c0_78 = arith.constant 0 : index
      %c0_79 = arith.constant 0 : index
      %140 = vector.load %arg9[%139, %c0_78, %c0_79] : memref<4x8x32xbf16, #tpu.memory_space<vmem>>, vector<1x8x32xbf16>
      %141 = vector.shape_cast %140 : vector<1x8x32xbf16> to vector<8x32xbf16>
      %cst_80 = arith.constant dense<0.000000e+00> : vector<8x32xf32>
      %142 = tpu.matmul %138, %141, %cst_80 {dimension_numbers = #tpu.dot_dimension_numbers<[1], [0], [0], [1], [0, 0, 1, 1], [], []>} : vector<8x8xbf16>, vector<8x32xbf16>, vector<8x32xf32> -> vector<8x32xf32>
      %143 = arith.addf %136, %142 : vector<8x32xf32>
      %c0_81 = arith.constant 0 : index
      %c0_82 = arith.constant 0 : index
      %144 = vector.load %arg21[%c0_81, %c0_82] : memref<8x32xf32, #tpu.memory_space<vmem>>, vector<8x32xf32>
      tpu.vector_store %arg21[%c0_81, %c0_82], %143 {strides = array<i32>} : memref<8x32xf32, #tpu.memory_space<vmem>>, vector<8x32xf32>,
    }
    %c4_i32_6 = arith.constant 4 : i32
    %c0_7 = arith.constant 0 : index
    %c0_8 = arith.constant 0 : index
    %c0_9 = arith.constant 0 : index
    %7 = vector.load %arg1[%c0_7, %c0_8, %c0_9] : memref<1x8x32xf32, #tpu.memory_space<vmem>>, vector<1x8x32xf32>
    %8 = vector.shape_cast %7 : vector<1x8x32xf32> to vector<8x32xf32>
    %c0_10 = arith.constant 0 : index
    %c0_11 = arith.constant 0 : index
    %9 = vector.load %arg21[%c0_10, %c0_11] : memref<8x32xf32, #tpu.memory_space<vmem>>, vector<8x32xf32>
    %c0_12 = arith.constant 0 : index
    %c0_13 = arith.constant 0 : index
    %10 = vector.load %arg10[%c0_12, %c0_13] : memref<1x32xf32, #tpu.memory_space<vmem>>, vector<1x32xf32>
    %11 = vector.broadcast %10 : vector<1x32xf32> to vector<8x32xf32>
    %12 = arith.addf %9, %11 : vector<8x32xf32>
    %13 = arith.addf %8, %12 : vector<8x32xf32>
    %c0_14 = arith.constant 0 : index
    %c0_15 = arith.constant 0 : index
    %14 = vector.load %arg15[%c0_14, %c0_15] : memref<1x32xf32, #tpu.memory_space<vmem>>, vector<1x32xf32>
    %c0_16 = arith.constant 0 : index
    %c0_17 = arith.constant 0 : index
    %15 = vector.load %arg16[%c0_16, %c0_17] : memref<1x32xf32, #tpu.memory_space<vmem>>, vector<1x32xf32>
    %cst_18 = arith.constant dense<0.000000e+00> : vector<8xf32>
    %16 = vector.multi_reduction <add>, %13, %cst_18 [1] : vector<8x32xf32> to vector<8xf32>
    %17 = vector.shape_cast %16 : vector<8xf32> to vector<8x1xf32>
    %cst_19 = arith.constant 3.200000e+01 : f32
    %18 = vector.broadcast %cst_19 : f32 to vector<8x1xf32>
    %19 = arith.divf %17, %18 : vector<8x1xf32>
    %20 = vector.broadcast %19 : vector<8x1xf32> to vector<8x32xf32>
    %21 = arith.subf %13, %20 : vector<8x32xf32>
    %22 = arith.mulf %21, %21 : vector<8x32xf32>
    %cst_20 = arith.constant dense<0.000000e+00> : vector<8xf32>
    %23 = vector.multi_reduction <add>, %22, %cst_20 [1] : vector<8x32xf32> to vector<8xf32>
    %24 = vector.shape_cast %23 : vector<8xf32> to vector<8x1xf32>
    %cst_21 = arith.constant 3.200000e+01 : f32
    %25 = vector.broadcast %cst_21 : f32 to vector<8x1xf32>
    %26 = arith.divf %24, %25 : vector<8x1xf32>
    %27 = vector.broadcast %19 : vector<8x1xf32> to vector<8x32xf32>
    %28 = arith.subf %13, %27 : vector<8x32xf32>
    %cst_22 = arith.constant 9.99999974E-6 : f32
    %29 = vector.broadcast %cst_22 : f32 to vector<8x1xf32>
    %30 = arith.addf %26, %29 : vector<8x1xf32>
    %31 = math.rsqrt %30 : vector<8x1xf32>
    %32 = vector.broadcast %31 : vector<8x1xf32> to vector<8x32xf32>
    %33 = arith.mulf %28, %32 : vector<8x32xf32>
    %34 = vector.broadcast %14 : vector<1x32xf32> to vector<8x32xf32>
    %35 = arith.mulf %33, %34 : vector<8x32xf32>
    %36 = vector.broadcast %15 : vector<1x32xf32> to vector<8x32xf32>
    %37 = arith.addf %35, %36 : vector<8x32xf32>
    %38 = arith.truncf %37 : vector<8x32xf32> to vector<8x32xbf16>
    %c0_23 = arith.constant 0 : index
    %c0_24 = arith.constant 0 : index
    %39 = vector.load %arg11[%c0_23, %c0_24] : memref<32x64xbf16, #tpu.memory_space<vmem>>, vector<32x64xbf16>
    %cst_25 = arith.constant dense<0.000000e+00> : vector<8x64xf32>
    %40 = tpu.matmul %38, %39, %cst_25 {dimension_numbers = #tpu.dot_dimension_numbers<[1], [0], [0], [1], [0, 0, 1, 1], [], []>} : vector<8x32xbf16>, vector<32x64xbf16>, vector<8x64xf32> -> vector<8x64xf32>
    %c0_26 = arith.constant 0 : index
    %c0_27 = arith.constant 0 : index
    %41 = vector.load %arg12[%c0_26, %c0_27] : memref<1x64xf32, #tpu.memory_space<vmem>>, vector<1x64xf32>
    %42 = vector.broadcast %41 : vector<1x64xf32> to vector<8x64xf32>
    %43 = arith.addf %40, %42 : vector<8x64xf32>
    %cst_28 = arith.constant 0.000000e+00 : f32
    %44 = vector.broadcast %cst_28 : f32 to vector<8x64xf32>
    %45 = arith.maximumf %43, %44 : vector<8x64xf32>
    %46 = arith.truncf %45 : vector<8x64xf32> to vector<8x64xbf16>
    %c0_29 = arith.constant 0 : index
    %c0_30 = arith.constant 0 : index
    %47 = vector.load %arg13[%c0_29, %c0_30] : memref<64x32xbf16, #tpu.memory_space<vmem>>, vector<64x32xbf16>
    %cst_31 = arith.constant dense<0.000000e+00> : vector<8x32xf32>
    %48 = tpu.matmul %46, %47, %cst_31 {dimension_numbers = #tpu.dot_dimension_numbers<[1], [0], [0], [1], [0, 0, 1, 1], [], []>} : vector<8x64xbf16>, vector<64x32xbf16>, vector<8x32xf32> -> vector<8x32xf32>
    %c0_32 = arith.constant 0 : index
    %c0_33 = arith.constant 0 : index
    %49 = vector.load %arg14[%c0_32, %c0_33] : memref<1x32xf32, #tpu.memory_space<vmem>>, vector<1x32xf32>
    %50 = vector.broadcast %49 : vector<1x32xf32> to vector<8x32xf32>
    %51 = arith.addf %48, %50 : vector<8x32xf32>
    %52 = arith.addf %37, %51 : vector<8x32xf32>
    %c0_34 = arith.constant 0 : index
    %c0_35 = arith.constant 0 : index
    %53 = vector.load %arg17[%c0_34, %c0_35] : memref<1x32xf32, #tpu.memory_space<vmem>>, vector<1x32xf32>
    %c0_36 = arith.constant 0 : index
    %c0_37 = arith.constant 0 : index
    %54 = vector.load %arg18[%c0_36, %c0_37] : memref<1x32xf32, #tpu.memory_space<vmem>>, vector<1x32xf32>
    %cst_38 = arith.constant dense<0.000000e+00> : vector<8xf32>
    %55 = vector.multi_reduction <add>, %52, %cst_38 [1] : vector<8x32xf32> to vector<8xf32>
    %56 = vector.shape_cast %55 : vector<8xf32> to vector<8x1xf32>
    %cst_39 = arith.constant 3.200000e+01 : f32
    %57 = vector.broadcast %cst_39 : f32 to vector<8x1xf32>
    %58 = arith.divf %56, %57 : vector<8x1xf32>
    %59 = vector.broadcast %58 : vector<8x1xf32> to vector<8x32xf32>
    %60 = arith.subf %52, %59 : vector<8x32xf32>
    %61 = arith.mulf %60, %60 : vector<8x32xf32>
    %cst_40 = arith.constant dense<0.000000e+00> : vector<8xf32>
    %62 = vector.multi_reduction <add>, %61, %cst_40 [1] : vector<8x32xf32> to vector<8xf32>
    %63 = vector.shape_cast %62 : vector<8xf32> to vector<8x1xf32>
    %cst_41 = arith.constant 3.200000e+01 : f32
    %64 = vector.broadcast %cst_41 : f32 to vector<8x1xf32>
    %65 = arith.divf %63, %64 : vector<8x1xf32>
    %66 = vector.broadcast %58 : vector<8x1xf32> to vector<8x32xf32>
    %67 = arith.subf %52, %66 : vector<8x32xf32>
    %cst_42 = arith.constant 9.99999974E-6 : f32
    %68 = vector.broadcast %cst_42 : f32 to vector<8x1xf32>
    %69 = arith.addf %65, %68 : vector<8x1xf32>
    %70 = math.rsqrt %69 : vector<8x1xf32>
    %71 = vector.broadcast %70 : vector<8x1xf32> to vector<8x32xf32>
    %72 = arith.mulf %67, %71 : vector<8x32xf32>
    %73 = vector.broadcast %53 : vector<1x32xf32> to vector<8x32xf32>
    %74 = arith.mulf %72, %73 : vector<8x32xf32>
    %75 = vector.broadcast %54 : vector<1x32xf32> to vector<8x32xf32>
    %76 = arith.addf %74, %75 : vector<8x32xf32>
    %77 = vector.shape_cast %76 : vector<8x32xf32> to vector<1x8x32xf32>
    %c0_43 = arith.constant 0 : index
    %c0_44 = arith.constant 0 : index
    %c0_45 = arith.constant 0 : index
    %78 = vector.load %arg19[%c0_43, %c0_44, %c0_45] : memref<1x8x32xf32, #tpu.memory_space<vmem>>, vector<1x8x32xf32>
    tpu.vector_store %arg19[%c0_43, %c0_44, %c0_45], %77 {strides = array<i32>} : memref<1x8x32xf32, #tpu.memory_space<vmem>>, vector<1x8x32xf32>,
    return
  }
  func.func @transform_0(%arg0: i32) -> (i32, i32, i32) {
    %c0_i32 = arith.constant 0 : i32
    %c0_i32_0 = arith.constant 0 : i32
    %c0_i32_1 = arith.constant 0 : i32
    return %arg0, %c0_i32, %c0_i32_0 : i32, i32, i32
  }
  func.func @transform_1(%arg0: i32) -> (i32, i32, i32) {
    %c0_i32 = arith.constant 0 : i32
    %c0_i32_0 = arith.constant 0 : i32
    %c0_i32_1 = arith.constant 0 : i32
    return %arg0, %c0_i32, %c0_i32_0 : i32, i32, i32
  }
  func.func @transform_2(%arg0: i32) -> (i32, i32, i32) {
    %c0_i32 = arith.constant 0 : i32
    %c0_i32_0 = arith.constant 0 : i32
    %c0_i32_1 = arith.constant 0 : i32
    %c0_i32_2 = arith.constant 0 : i32
    return %c0_i32, %c0_i32_0, %c0_i32_1 : i32, i32, i32
  }
  func.func @transform_3(%arg0: i32) -> (i32, i32, i32) {
    %c0_i32 = arith.constant 0 : i32
    %c0_i32_0 = arith.constant 0 : i32
    %c0_i32_1 = arith.constant 0 : i32
    %c0_i32_2 = arith.constant 0 : i32
    return %c0_i32, %c0_i32_0, %c0_i32_1 : i32, i32, i32
  }
  func.func @transform_4(%arg0: i32) -> (i32, i32, i32) {
    %c0_i32 = arith.constant 0 : i32
    %c0_i32_0 = arith.constant 0 : i32
    %c0_i32_1 = arith.constant 0 : i32
    %c0_i32_2 = arith.constant 0 : i32
    return %c0_i32, %c0_i32_0, %c0_i32_1 : i32, i32, i32
  }
  func.func @transform_5(%arg0: i32) -> (i32, i32, i32) {
    %c0_i32 = arith.constant 0 : i32
    %c0_i32_0 = arith.constant 0 : i32
    %c0_i32_1 = arith.constant 0 : i32
    %c0_i32_2 = arith.constant 0 : i32
    return %c0_i32, %c0_i32_0, %c0_i32_1 : i32, i32, i32
  }
  func.func @transform_6(%arg0: i32) -> (i32, i32, i32) {
    %c0_i32 = arith.constant 0 : i32
    %c0_i32_0 = arith.constant 0 : i32
    %c0_i32_1 = arith.constant 0 : i32
    %c0_i32_2 = arith.constant 0 : i32
    return %c0_i32, %c0_i32_0, %c0_i32_1 : i32, i32, i32
  }
  func.func @transform_7(%arg0: i32) -> (i32, i32, i32) {
    %c0_i32 = arith.constant 0 : i32
    %c0_i32_0 = arith.constant 0 : i32
    %c0_i32_1 = arith.constant 0 : i32
    %c0_i32_2 = arith.constant 0 : i32
    return %c0_i32, %c0_i32_0, %c0_i32_1 : i32, i32, i32
  }
  func.func @transform_8(%arg0: i32) -> (i32, i32, i32) {
    %c0_i32 = arith.constant 0 : i32
    %c0_i32_0 = arith.constant 0 : i32
    %c0_i32_1 = arith.constant 0 : i32
    %c0_i32_2 = arith.constant 0 : i32
    return %c0_i32, %c0_i32_0, %c0_i32_1 : i32, i32, i32
  }
  func.func @transform_9(%arg0: i32) -> (i32, i32) {
    %c0_i32 = arith.constant 0 : i32
    %c0_i32_0 = arith.constant 0 : i32
    %c0_i32_1 = arith.constant 0 : i32
    return %c0_i32, %c0_i32_0 : i32, i32
  }
  func.func @transform_10(%arg0: i32) -> (i32, i32) {
    %c0_i32 = arith.constant 0 : i32
    %c0_i32_0 = arith.constant 0 : i32
    %c0_i32_1 = arith.constant 0 : i32
    return %c0_i32, %c0_i32_0 : i32, i32
  }
  func.func @transform_11(%arg0: i32) -> (i32, i32) {
    %c0_i32 = arith.constant 0 : i32
    %c0_i32_0 = arith.constant 0 : i32
    %c0_i32_1 = arith.constant 0 : i32
    return %c0_i32, %c0_i32_0 : i32, i32
  }
  func.func @transform_12(%arg0: i32) -> (i32, i32) {
    %c0_i32 = arith.constant 0 : i32
    %c0_i32_0 = arith.constant 0 : i32
    %c0_i32_1 = arith.constant 0 : i32
    return %c0_i32, %c0_i32_0 : i32, i32
  }
  func.func @transform_13(%arg0: i32) -> (i32, i32) {
    %c0_i32 = arith.constant 0 : i32
    %c0_i32_0 = arith.constant 0 : i32
    %c0_i32_1 = arith.constant 0 : i32
    return %c0_i32, %c0_i32_0 : i32, i32
  }
  func.func @transform_14(%arg0: i32) -> (i32, i32) {
    %c0_i32 = arith.constant 0 : i32
    %c0_i32_0 = arith.constant 0 : i32
    %c0_i32_1 = arith.constant 0 : i32
    return %c0_i32, %c0_i32_0 : i32, i32
  }
  func.func @transform_15(%arg0: i32) -> (i32, i32) {
    %c0_i32 = arith.constant 0 : i32
    %c0_i32_0 = arith.constant 0 : i32
    %c0_i32_1 = arith.constant 0 : i32
    return %c0_i32, %c0_i32_0 : i32, i32
  }
  func.func @transform_16(%arg0: i32) -> (i32, i32) {
    %c0_i32 = arith.constant 0 : i32
    %c0_i32_0 = arith.constant 0 : i32
    %c0_i32_1 = arith.constant 0 : i32
    return %c0_i32, %c0_i32_0 : i32, i32
  }
  func.func @transform_17(%arg0: i32) -> (i32, i32) {
    %c0_i32 = arith.constant 0 : i32
    %c0_i32_0 = arith.constant 0 : i32
    %c0_i32_1 = arith.constant 0 : i32
    return %c0_i32, %c0_i32_0 : i32, i32
  }
  func.func @transform_18(%arg0: i32) -> (i32, i32, i32) {
    %c0_i32 = arith.constant 0 : i32
    %c0_i32_0 = arith.constant 0 : i32
    %c0_i32_1 = arith.constant 0 : i32
    return %arg0, %c0_i32, %c0_i32_0 : i32, i32, i32
  }
}

</mosaic_0001>

<bundles_post_ra>
// kernel: tpu_custom_call.1
= control target key start
LH: loop header
LB: loop body
LE: loop exit
PB: predicated region body
PF: predicated region fallthrough
CT: control target
= control target key end

     0   :  { %s1888_s0 = inlined_call_operand.vmem [shape: f32[2,8,32], index: 0, kind: input, shape index: {}]   ;;  %s1889_s1 = inlined_call_operand.vmem [shape: f32[2,8,8], index: 1, kind: input, shape index: {}]   ;;  %s1890_s2 = inlined_call_operand.vmem [shape: bf16[4,32,8], index: 2, kind: input, shape index: {}]   ;;  %s1891_s3 = inlined_call_operand.vmem [shape: f32[4,1,8], index: 3, kind: input, shape index: {}]   ;;  %s1892_s4 = inlined_call_operand.vmem [shape: bf16[4,32,8], index: 4, kind: input, shape index: {}]   ;;  %s1893_s5 = inlined_call_operand.vmem [shape: f32[4,1,8], index: 5, kind: input, shape index: {}]   ;;  %s1894_s6 = inlined_call_operand.vmem [shape: bf16[4,32,8], index: 6, kind: input, shape index: {}]   ;;  %s1895_s7 = inlined_call_operand.vmem [shape: f32[4,1,8], index: 7, kind: input, shape index: {}]   ;;  %s1896_s8 = inlined_call_operand.vmem [shape: bf16[4,8,32], index: 8, kind: input, shape index: {}]   ;;  %s1897_s9 = inlined_call_operand.vmem [shape: f32[1,32], index: 9, kind: input, shape index: {}]   ;;  %s1898_s10 = inlined_call_operand.vmem [shape: bf16[32,64], index: 10, kind: input, shape index: {}]   ;;  %s1899_s11 = inlined_call_operand.vmem [shape: f32[1,64], index: 11, kind: input, shape index: {}]   ;;  %s1900_s12 = inlined_call_operand.vmem [shape: bf16[64,32], index: 12, kind: input, shape index: {}]   ;;  %s1901_s13 = inlined_call_operand.vmem [shape: f32[1,32], index: 13, kind: input, shape index: {}]   ;;  %s1902_s14 = inlined_call_operand.vmem [shape: f32[1,32], index: 14, kind: input, shape index: {}]   ;;  %s1903_s15 = inlined_call_operand.vmem [shape: f32[1,32], index: 15, kind: input, shape index: {}]   ;;  %s1904_s16 = inlined_call_operand.vmem [shape: f32[1,32], index: 16, kind: input, shape index: {}]   ;;  %s1905_s17 = inlined_call_operand.vmem [shape: f32[1,32], index: 17, kind: input, shape index: {}]   ;;  %s1906_s18 = inlined_call_operand.hbm [shape: f32[2,8,32], index: 18, kind: output, shape index: {}]  }
   0x1   :  { %1915 = sst [smem:[#allocation13_spill]] %s1888_s0 }
   0x2   :  { %1916 = sst [smem:[#allocation14_spill]] %s1889_s1 }
   0x3   :  { %1917 = sst [smem:[#allocation15_spill]] %s1890_s2 }
   0x4   :  { %1918 = sst [smem:[#allocation16_spill]] %s1904_s16 }
   0x5   :  { %1919 = sst [smem:[#allocation17_spill]] %s1905_s17 }
   0x6   :  { %1920 = sst [smem:[#allocation18_spill]] %s1906_s18 }
   0x7   :  { %23 = vsyncpa [#allocation5], 0 }
   0x8   :  { %25 = vsyncpa [#allocation5 + $0x1], 0  ;;  %s1671_s27 = smov 0   ;;  %s1673_s28 = smov 0  }
   0x9   :  { %s1675_s29 = smov 0   ;;  %s1677_s30 = smov 0  }
   0xa LB: > { %1921 = sst [smem:[#allocation7_spill]] %s1553_s27  ;;  %s1692_s0 = sadd.s32 4294967295, %s1565_s30   ;;  %s1565_s30 = sphi %s1677_s30, %s1941_s30   ;;  %s1561_s29 = sphi %s1675_s29, %s1943_s29   ;;  %s1557_s28 = sphi %s1673_s28, %s1945_s28   ;;  %s1553_s27 = sphi %s1671_s27, %s1944_s27  }
   0xb   : > { %1922 = sst [smem:[#allocation8_spill]] %s1561_s29  ;;  %s1296_s19 = sadd.s32 4294967294, %s1565_s30  }
   0xc   : > { %1923 = sst [smem:[#allocation9_spill]] %s1565_s30  ;;  %s1696_s1 = sadd.s32 1, %s1565_s30  }
   0xd   : > { %1924 = sst [smem:[#allocation10_spill]] %s1696_s1  ;;  %s426_s20 = sadd.s32 1, %s1561_s29 }
   0xe   : > { %s423_s21 = ssub.s32 %s1565_s30, %s1696_s1  ;;  %p436_p0 = scmp.ne.s32.totalorder %s1561_s29, %s1557_s28 }
   0xf   : > { %p424_p1 = scmp.eq.s32.totalorder %s423_s21, 0  ;;  %p437_p2 = scmp.eq.s32.totalorder %s1692_s0, 1 }
  0x10   : > { %p442_p3 = scmp.ne.s32.totalorder %s1557_s28, %s1553_s27  ;;  %p443_p4 = scmp.eq.s32.totalorder %s1296_s19, 1 }
  0x11   : > { %s1707_s22 = scalar_select %p424_p1, %s1561_s29, %s426_s20  }
  0x12   : > { %p1709_p5 = por %p437_p2, %p436_p0  ;;  %p1713_p6 = por %p443_p4, %p442_p3 }
  0x13   : > { %1925 = sst [smem:[#allocation11_spill]] %s1707_s22  ;;  %p1299_p7 = scmp.ge.s32.totalorder %s1565_s30, 1 }
  0x14   : > { %s1927_s23 = scalar_select %p1713_p6, 1, 0 }
  0x15   : > { %p523_p8 = scmp.lt.s32.totalorder %s1565_s30, 3 }
  0x16   : > { %1928 = sst [smem:[#allocation12_spill]] %s1927_s23 }
  0x17   : > { %p524_p9 = pnand %p1299_p7, %p523_p8 }
  0x18   : > { %s1913_s24 = sand.u32 (!%p524_p9), 1, %s1557_s28   ;;  %p580_p10 = scmp.lt.s32.totalorder (!%p524_p9), %s1692_s0, 1 }
  0x19   : > { %527 = sbr.rel (%p524_p9) target bundleno = 2190 (0x88e), region = 92  ;;  %s1723_s25 = sshll.u32 (!%p524_p9), %s1913_s24, 3 }
  0x1a   : > { %s1929_s22 = sld [smem:[#allocation13_spill]] (!%p524_p9)  ;;  %s1740_s18 = smov (!%p524_p9), 0  }
  0x1b   : > { %s1930_s27 = sld [smem:[#allocation14_spill]] (!%p524_p9) }
  0x1e   : > { %vm593_vm0 = vcmask 261120   ;;  %v1571_v0 = vmov 0.0   ;;  %s581_s26 = scalar_select %p580_p10, %s1692_s0, 1  ;;  %vm591_vm1 = vcmask 257024  }
  0x1f   : > { %594 = vst.msk [vmem:[#allocation3] sm:$0xff] %vm593_vm0, %v1571_v0 }
  0x20   : > { %s1301_s19 = sshll.u32 %s581_s26, 3 }
  0x21   : > { %s1731_s29 = scalar_lea.vmem %s1929_s22, %s1301_s19  ;;  %s1736_s30 = scalar_lea.vmem %s1930_s27, %s1301_s19 }
  0x22   : > { %v589_v1 = vld [vmem:[%s1731_s29] sm:$0xff] }
  0x23   : > { %v590_v2 = vpack.c.bf16 %v589_v1, %v589_v1 }
  0x25   : > { %592 = vst.msk [vmem:[#allocation2] sm:$0xf] %vm591_vm1, %v590_v2 }
  0x26 LB: >> { %v1572_v3 = vmov 0.0   ;;  %s1342_s1 = sshll.u32 %s1569_s18, 4  ;;  %vm1573_vm2 = vmmov 0   ;;  %s1931_s20 = sld [smem:[#allocation15_spill]]  ;;  %vm808_vm3 = vcmask 64512   ;;  %v855_v27 = vld [vmem:[%s1736_s30] sm:$0xff]  ;;  %s1569_s18 = sphi %s1740_s18, %s600_s18  }
  0x27   : >> { %1376 = vmatprep.subr.bf16.mxu1 %v1572_v3  ;;  %1368 = vmatprep.subr.bf16.mxu0 %v1572_v3  ;;  %s674_s23 = scalar_lea.vmem %s1892_s4, %s1342_s1  ;;  %s1757_s16 = scalar_lea.vmem %s1894_s6, %s1342_s1  ;;  %vm856_vm4 = vcmp.gt.f32.partialorder %v855_v27, 0.0  ;;  %vm874_vm5 = vcmask 1043456   ;;  %v918_v58 = vld [vmem:[#allocation3] sm:$0xff] }
  0x28   : >> { %1380 = vmatprep.mubr.msk.bf16.mxu1 %vm1573_vm2, %v1572_v3  ;;  %1372 = vmatprep.mubr.msk.bf16.mxu0 %vm1573_vm2, %v1572_v3  ;;  %v1481_v4 = vld [vmem:[%s674_s23 + $0x8] sm:$0xff]   ;;  %v1483_v6 = vld [vmem:[%s674_s23] sm:$0xff]   ;;  %s609_s23 = scalar_lea.vmem %s1891_s3, %s1569_s18  ;;  %s745_s19 = scalar_lea.vmem %s1895_s7, %s1569_s18 }
  0x29   : >> { %1377 = vmatpush3.bf16.msra.mxu1 %v1481_v4  ;;  %v1305_v10 = vld [vmem:[%s609_s23] ss:$0 sm:$0xff]  ;;  %v1485_v25 = vld [vmem:[%s1757_s16 + $0x8] sm:$0xff]  }
  0x2a   : >> { %1378 = vmatprep.subr.bf16.mxu1 %v1572_v3  ;;  %v1486_v26 = vld [vmem:[%s1757_s16] sm:$0xff]  }
  0x2b   : >> { %v1315_v40 = vld [vmem:[%s745_s19] ss:$0 sm:$0xff] }
  0x2c   : >> { %s604_s21 = scalar_lea.vmem %s1931_s20, %s1342_s1  ;;  %v601_v8 = vld [vmem:[#allocation2] sm:$0xf]  ;;  %s679_s1 = scalar_lea.vmem %s1893_s5, %s1569_s18 }
  0x2d   : >> { %v1482_v5 = vld [vmem:[%s604_s21 + $0x8] sm:$0xff]   ;;  %v1484_v7 = vld [vmem:[%s604_s21] sm:$0xff]   ;;  %1379 = vmatpush3.bf16.msra.mxu1 %v1483_v6  ;;  %s1321_s20 = sshll.u32 %s1569_s18, 2  ;;  %s600_s18 = sadd.s32 1, %s1569_s18  }
  0x2e   : >> { %1369 = vmatpush3.bf16.msra.mxu0 %v1482_v5  ;;  %1392 = vmatprep.subr.bf16.mxu1 %v1572_v3  ;;  %v1310_v9 = vld [vmem:[%s679_s1] ss:$0 sm:$0xff]  ;;  %s921_s24 = scalar_lea.vmem %s1896_s8, %s1321_s20  ;;  %p597_p11 = scmp.ge.s32.totalorder %s600_s18, 4  }
  0x2f   : >> { %1370 = vmatprep.subr.bf16.mxu0 %v1572_v3  ;;  %v922_v47 = vld [vmem:[%s921_s24] sm:$0xf]  ;;  %vm1574_vm6 = vmmov (%p597_p11), 0   ;;  %vm1120_vm7 = vcmask (%p597_p11), 523264   ;;  %s1932_s20 = sld [smem:[#allocation16_spill]] (%p597_p11)  ;;  %s1339_s1 = sshll.u32 (%p597_p11), %s1692_s0, 7 }
  0x30   : >> { %1381 = vmatmul.mubr.msk.bf16.vlgmr.msra.gmra.mxu1 %vm593_vm0, %v601_v8  ;;  %v927_v48 = vsel %vm874_vm5, %v922_v47, 0  ;;  %v971_v1 = vld [vmem:[%s1731_s29] sm:$0xff] (%p597_p11)  ;;  %s1933_s24 = sld [smem:[#allocation17_spill]] (%p597_p11)  ;;  %s1934_s27 = scalar_lea.vmem (%p597_p11), [#allocation4], %s1723_s25 }
  0x31   : >> { %1394 = vmatprep.mubr.msk.bf16.mxu1 %vm1573_vm2, %v1572_v3  ;;  %v1496_v27 = vld [vmem:[%s1900_s12] sm:$0xff] (%p597_p11)   ;;  %s1209_s18 = sshll.u32 (%p597_p11), %s1934_s27, 4  ;;  %s1935_s22 = sld [smem:[#allocation18_spill]] (%p597_p11)  ;;  %s1210_s18 = int_to_ptr.vmem [resolvable:$true] %s1209_s18 }
  0x32   : >> { %1371 = vmatpush3.bf16.msra.mxu0 %v1484_v7  ;;  %s1936_s16 = smov (%p597_p11), %s1934_s27  ;;  %s1937_s26 = sand.u32 (%p597_p11), 1, %s1557_s28  }
  0x33   : >> { %1384 = vmatprep.subr.bf16.mxu0 %v1572_v3  ;;  %s1196_s19 = scalar_lea.sflag (%p597_p11), [#allocation5], %s1937_s26  ;;  %s1575_s0 = smov (%p597_p11), [#allocation4]  }
  0x34   : > { %s1505_s21 = sshll.u32 (%p597_p11), %s1575_s0, 4  ;;  %s1506_s21 = int_to_ptr.vmem [resolvable:$false] %s1505_s21 }
  0x35   : >> { %1373 = vmatmul.mubr.msk.bf16.vlgmr.msra.gmra.mxu0 %vm593_vm0, %v601_v8  ;;  %s1507_s17 = scalar_lea.vmem (%p597_p11), %s1506_s21, 256  ;;  %p1508_p1 = scmp.lt.s32.totalorder (%p597_p11), %s1210_s18, %s1506_s21 }
  0x36   : >> { %1388 = vmatprep.mubr.msk.bf16.mxu0 %vm1573_vm2, %v1572_v3  ;;  %1385 = vmatpush3.bf16.msra.mxu0 %v1485_v25 }
  0x37   : >> { %1386 = vmatprep.subr.bf16.mxu0 %v1572_v3  ;;  %s1207_s23 = scalar_lea.hbm (%p597_p11), %s1935_s22, %s1339_s1 }
  0x3a   : >> { %1387 = vmatpush3.bf16.msra.mxu0 %v1486_v26  ;;  %v1495_v26 = vld [vmem:[%s1900_s12 + $0x8] sm:$0xff] (%p597_p11)  }
  0x3b   : >> { %1398 = vmatprep.subr.bf16.mxu0 %v1572_v3 }
  0x3d   : >> { %1389 = vmatmul.mubr.msk.bf16.vlgmr.msra.gmra.mxu0 %vm593_vm0, %v601_v8 }
  0x3e   : >> { %1400 = vmatprep.mubr.msk.bf16.mxu0 %vm1573_vm2, %v1572_v3 }
  0xf0   : >> { %v733_v11 = vpop.f32.mrf.mxu1 }
  0xf1   : >> { %v734_v12 = vadd.f32 %v1310_v9, %v733_v11 }
  0xf2   : >> { %v1382_v15 = vpop.f32.mrf.mxu1 }
  0xf3   : >> { %v806_v16 = vpack.c.bf16 %v734_v12, %v734_v12  ;;  %v1491_v12 = vld [vmem:[%s1898_s10 + $0x8] sm:$0xff] (%p597_p11)   ;;  %v1494_v15 = vld [vmem:[%s1900_s12 + $0x10] sm:$0xff] (%p597_p11)  }
  0xf4   : >> { %v736_v18 = vpop.f32.mrf.mxu1 }
  0xf5   : >> { %v666_v13 = vpop.f32.mrf.mxu0  ;;  %v813_v19 = vsel %vm808_vm3, %v806_v16, 0 }
  0xf6   : >> { %v667_v14 = vadd.f32 %v1305_v10, %v666_v13  ;;  %v1383_v22 = vpop.f32.mrf.mxu1  ;;  %1393 = vmatpush3.bf16.xpose.msra.mxu1 %v813_v19  ;;  %v1492_v13 = vld [vmem:[%s1898_s10] sm:$0xff] (%p597_p11)  }
  0xf7   : >> { %v1374_v17 = vpop.f32.mrf.mxu0  ;;  %1404 = vmatprep.subr.bf16.mxu1 %v1572_v3  ;;  %v1325_v22 = vld [vmem:[%s1903_s15] ss:$0 sm:$0xff] (%p597_p11) }
  0xf8   : >> { %v672_v20 = vmul.f32 0.35355338, %v667_v14  ;;  %v1493_v14 = vld [vmem:[%s1900_s12 + $0x18] sm:$0xff] (%p597_p11)  }
  0xf9   : >> { %v669_v21 = vpop.f32.mrf.mxu0 }
  0xfa   : >> { %v805_v24 = vpack.c.bf16 %v672_v20, %v672_v20  ;;  %v1324_v20 = vld [vmem:[%s1902_s14] ss:$0 sm:$0xff] (%p597_p11) }
  0xfb   : >> { %v1375_v23 = vpop.f32.mrf.mxu0 }
  0xfd   : >> { %1395 = vmatmul.mubr.msk.bf16.vlgmr.msra.gmra.mxu1 %vm808_vm3, %v805_v24  ;;  %v799_v39 = vpop.f32.mrf.mxu0 }
  0xfe   : >> { %1406 = vmatprep.mubr.msk.bf16.mxu1 %vm1573_vm2, %v1572_v3  ;;  %v800_v41 = vadd.f32 %v1315_v40, %v799_v39  ;;  %1405 = vmatpush3.bf16.msra.mxu1 %v927_v48  ;;  %v1323_v3 = vld [vmem:[%s1897_s9] ss:$0 sm:$0xff] (%p597_p11) }
  0xff   : >> { %v1390_v42 = vpop.f32.mrf.mxu0  ;;  %1418 = vmatprep.subr.bf16.mxu1 (%p597_p11), %v1571_v0 }
 0x100   : >> { %v807_v43 = vpack.c.bf16 %v800_v41, %v800_v41 }
 0x101   : >> { %v802_v44 = vpop.f32.mrf.mxu0 }
 0x102   : >> { %v876_v45 = vsel %vm874_vm5, %v807_v43, 0 }
 0x103   : >> { %v1391_v46 = vpop.f32.mrf.mxu0  ;;  %1399 = vmatpush3.bf16.msra.mxu0 %v876_v45 }
 0x104   : > { %1410 = vmatprep.subr.bf16.mxu0 (%p597_p11), %v1571_v0 }
 0x1bd   : >> { %v849_v28 = vpop.f32.mrf.mxu1 }
 0x1be   : >> { %v857_v29 = vsel %vm856_vm4, %v849_v28, -1e+09  ;;  %v1326_v28 = vld [vmem:[%s1899_s11] ss:$0 sm:$0xff] (%p597_p11) }
 0x1bf   : >> { %v1396_v30 = vpop.f32.mrf.mxu1  ;;  %v858_v31 = vsel %vm808_vm3, %v857_v29, -inf }
 0x1c0   : >> { %859 = vmax.xlane.f32.xlu0 %v858_v31 }
 0x1c1   : >> { %v852_v32 = vpop.f32.mrf.mxu1 }
 0x1c3   : >> { %v1397_v33 = vpop.f32.mrf.mxu1 }
 0x249   : >> { %v860_v34 = vpop.xlane.xlu0 %859 }
 0x24a   : >> { %v861_v35 = vsub.f32 %v857_v29, %v860_v34 }
 0x24c   : >> { %v862_v36 = vmul.f32 1.442695, %v861_v35 }
 0x24e   : >> { %1487 = vpow2.f32 %v862_v36 }
 0x25b   : >> { %v1488_v37 = vpop.eup %1487 }
 0x25c   : >> { %v864_v38 = vsel %vm808_vm3, %v1488_v37, 0.0 }
 0x25d   : >> { %865 = vadd.xlane.f32.xlu0 %v864_v38 }
 0x2e6   : >> { %v866_v49 = vpop.xlane.xlu0 %865 }
 0x2e7   : >> { %1489 = vrcp.f32 %v866_v49 }
 0x2f4   : >> { %v1490_v50 = vpop.eup %1489 }
 0x2f5   : >> { %v869_v51 = vmul.f32 %v1490_v50, %v1488_v37 }
 0x2f7   : >> { %v870_v52 = vpack.c.bf16 %v869_v51, %v869_v51 }
 0x2f9   : >> { %1401 = vmatmul.mubr.msk.bf16.vlgmr.msra.gmra.mxu0 %vm808_vm3, %v870_v52  ;;  %v1336_v52 = vld [vmem:[%s1932_s20] ss:$0 sm:$0xff] (%p597_p11)  ;;  %s1501_s20 = scalar_lea.vmem (%p597_p11), %s1210_s18, 128 }
 0x2fa   : > { %1414 = vmatprep.mubr.msk.bf16.mxu0 (%p597_p11), %vm1574_vm6, %v1571_v0  ;;  %1411 = vmatpush3.bf16.msra.mxu0 (%p597_p11), %v1491_v12  ;;  %p1502_p12 = scmp.ne.s32.totalorder (%p597_p11), %s1210_s18, %s1501_s20  ;;  %p1509_p2 = scmp.lt.s32.totalorder (%p597_p11), %s1507_s17, %s1501_s20 }
 0x2fb   : > { %1412 = vmatprep.subr.bf16.mxu0 (%p597_p11), %v1571_v0 }
 0x2fc   : > { %p1503_p13 = pnand (%p597_p11), %p1502_p12, %p1709_p5  ;;  %p1510_p3 = por (%p597_p11), %p1509_p2, %p1508_p1 }
 0x2fe   : > { %1413 = vmatpush3.bf16.msra.mxu0 (%p597_p11), %v1492_v13  ;;  %p1504_p0 = pneg (%p597_p11), %p1503_p13 }
 0x300   : > { %p1511_p4 = pnand (%p597_p11), %p1510_p3, %p1504_p0 }
 0x3b9   : >> { %v912_v53 = vpop.f32.mrf.mxu0 }
 0x3ba   : >> { %v919_v54 = vpack.c.bf16 %v912_v53, %v912_v53 }
 0x3bb   : >> { %v1402_v55 = vpop.f32.mrf.mxu0 }
 0x3bc   : >> { %1407 = vmatmul.mubr.msk.bf16.vlgmr.msra.gmra.mxu1 %vm808_vm3, %v919_v54  ;;  %v1337_v54 = vld [vmem:[%s1933_s24] ss:$0 sm:$0xff] (%p597_p11) }
 0x3bd   : >> { %v915_v56 = vpop.f32.mrf.mxu0  ;;  %1426 = vmatprep.mubr.msk.bf16.mxu1 (%p597_p11), %vm1574_vm6, %v1571_v0  ;;  %1419 = vmatpush3.bf16.msra.mxu1 (%p597_p11), %v1493_v14 }
 0x3be   : > { %1420 = vmatprep.subr.bf16.mxu1 (%p597_p11), %v1571_v0 }
 0x3bf   : >> { %v1403_v57 = vpop.f32.mrf.mxu0 }
 0x3c1   : > { %1421 = vmatpush3.bf16.msra.mxu1 (%p597_p11), %v1494_v15 }
 0x3c2   : > { %1422 = vmatprep.subr.bf16.mxu1 (%p597_p11), %v1571_v0 }
 0x3c5   : > { %1423 = vmatpush3.bf16.msra.mxu1 (%p597_p11), %v1495_v26 }
 0x3c6   : > { %1424 = vmatprep.subr.bf16.mxu1 (%p597_p11), %v1571_v0  ;;  %v1330_v0 = vld [vmem:[%s1901_s13] ss:$0 sm:$0xff] (%p597_p11) }
 0x3c9   : > { %1425 = vmatpush3.bf16.msra.mxu1 (%p597_p11), %v1496_v27 }
 0x47c   : >> { %v963_v59 = vpop.f32.mrf.mxu1 }
 0x47d   : >> { %v969_v60 = vadd.f32 %v963_v59, %v918_v58 }
 0x47e   : >> { %v1408_v61 = vpop.f32.mrf.mxu1 }
 0x47f   : >> { %970 = vst.msk [vmem:[#allocation3] sm:$0xff] %vm593_vm0, %v969_v60 }
 0x480   : >> { %v966_v62 = vpop.f32.mrf.mxu1 }
 0x482   : >> { %v1409_v63 = vpop.f32.mrf.mxu1 }
 0x483   : > { %599 = sbr.rel (!%p597_p11) target bundleno = 38 (0x26), region = 144 }
 0x486   : > { %v972_v2 = vld [vmem:[#allocation3] sm:$0xff] (%p597_p11) }
 0x487   : > { %v980_v4 = vadd.f32 (%p597_p11), %v1323_v3, %v972_v2 }
 0x489   : > { %v981_v5 = vadd.f32 %v980_v4, %v971_v1 }
 0x48b   : > { %v984_v6 = vsel %vm593_vm0, %v981_v5, 0.0 }
 0x48c   : > { %985 = vadd.xlane.f32.xlu0 %v984_v6 }
 0x515   : > { %v986_v7 = vpop.xlane.xlu0 %985 }
 0x516   : > { %v988_v8 = vmul.f32 0.03125, %v986_v7 }
 0x518   : > { %v989_v9 = vsub.f32 %v981_v5, %v988_v8 }
 0x51a   : > { %v990_v10 = vmul.f32 %v989_v9, %v989_v9 }
 0x51c   : > { %v991_v11 = vsel %vm593_vm0, %v990_v10, 0.0 }
 0x51d   : > { %992 = vadd.xlane.f32.xlu0 %v991_v11 }
 0x5a6   : > { %v993_v16 = vpop.xlane.xlu0 %992 }
 0x5a7   : > { %v994_v17 = vmul.f32 0.03125, %v993_v16 }
 0x5a9   : > { %v995_v18 = vadd.f32 1e-05, %v994_v17 }
 0x5ab   : > { %1497 = vrsqrt.f32 %v995_v18 }
 0x5b8   : > { %v1498_v19 = vpop.eup %1497 }
 0x5b9   : > { %v997_v21 = vmul.f32 %v1498_v19, %v989_v9 }
 0x5bb   : > { %v1004_v23 = vmul.f32 %v1324_v20, %v997_v21 }
 0x5bd   : > { %v1011_v24 = vadd.f32 %v1325_v22, %v1004_v23 }
 0x5bf   : > { %v1012_v25 = vpack.c.bf16 %v1011_v24, %v1011_v24 }
 0x5c1   : > { %1415 = vmatmul.mubr.msk.bf16.vlgmr.msra.gmra.mxu0 %vm593_vm0, %v1012_v25 }
 0x681   : > { %v1073_v29 = vpop.f32.mrf.mxu0 }
 0x682   : > { %v1074_v30 = vadd.f32 %v1326_v28, %v1073_v29 }
 0x683   : > { %v1416_v31 = vpop.f32.mrf.mxu0 }
 0x684   : > { %v1079_v32 = vmax.f32 %v1074_v30, 0.0 }
 0x685   : > { %v1076_v33 = vpop.f32.mrf.mxu0 }
 0x686   : > { %v1080_v34 = vpack.c.bf16 %v1079_v32, %v1079_v32 }
 0x687   : > { %v1417_v35 = vpop.f32.mrf.mxu0 }
 0x688   : > { %1427 = vmatmul.mubr.msk.bf16.vlgmr.msra.gmra.mxu1 %vm1120_vm7, %v1080_v34 }
 0x748   : > { %v1158_v36 = vpop.f32.mrf.mxu1 }
 0x749   : > { %v1159_v37 = vadd.f32 %v1330_v0, %v1158_v36 }
 0x74a   : > { %v1428_v38 = vpop.f32.mrf.mxu1 }
 0x74b   : > { %v1164_v39 = vadd.f32 %v1159_v37, %v1011_v24 }
 0x74c   : > { %v1161_v40 = vpop.f32.mrf.mxu1 }
 0x74d   : > { %v1167_v41 = vsel %vm593_vm0, %v1164_v39, 0.0 }
 0x74e   : > { %1168 = vadd.xlane.f32.xlu1 %v1167_v41  ;;  %v1429_v42 = vpop.f32.mrf.mxu1 }
 0x7d7   : > { %v1169_v43 = vpop.xlane.xlu1 %1168 }
 0x7d8   : > { %v1170_v44 = vmul.f32 0.03125, %v1169_v43 }
 0x7da   : > { %v1171_v45 = vsub.f32 %v1164_v39, %v1170_v44 }
 0x7dc   : > { %v1172_v46 = vmul.f32 %v1171_v45, %v1171_v45 }
 0x7de   : > { %v1173_v47 = vsel %vm593_vm0, %v1172_v46, 0.0 }
 0x7df   : > { %1174 = vadd.xlane.f32.xlu1 %v1173_v47 }
 0x868   : > { %v1175_v48 = vpop.xlane.xlu1 %1174 }
 0x869   : > { %v1176_v49 = vmul.f32 0.03125, %v1175_v48 }
 0x86b   : > { %v1177_v50 = vadd.f32 1e-05, %v1176_v49 }
 0x86d   : > { %1499 = vrsqrt.f32 %v1177_v50 }
 0x87a   : > { %v1500_v51 = vpop.eup %1499 }
 0x87b   : > { %v1179_v53 = vmul.f32 %v1500_v51, %v1171_v45 }
 0x87d   : > { %v1186_v55 = vmul.f32 %v1336_v52, %v1179_v53 }
 0x87f   : > { %v1193_v56 = vadd.f32 %v1337_v54, %v1186_v55 }
 0x881   : > { %1194 = vst.msk [vmem:[%s1936_s16] sm:$0xff] %vm593_vm0, %v1193_v56 }
 0x882   : > { %1514 = shalt.err (!%p1511_p4)
}
 0x883   : > { %s1515_s24 = scalar_lea.hbm %s1207_s23, 128  ;;  %s1519_s27 = scalar_lea.hbm %s1935_s22, 256 }
 0x884   : > { %p1516_p7 = scmp.ne.s32.totalorder %s1207_s23, %s1515_s24  ;;  %p1520_p10 = scmp.lt.s32.totalorder %s1207_s23, %s1935_s22 }
 0x885   : > { %p1521_p11 = scmp.lt.s32.totalorder %s1519_s27, %s1515_s24 }
 0x886   : > { %p1517_p8 = pnand %p1516_p7, %p1709_p5 }
 0x887   : > { %p1522_p12 = por %p1521_p11, %p1520_p10 }
 0x888   : > { %p1518_p9 = pneg %p1517_p8 }
 0x88a   : > { %p1523_p13 = pnand %p1522_p12, %p1518_p9 }
 0x88c   : > { %1526 = shalt.err (!%p1523_p13)
}
 0x88d   : > { %1430 = dma.vmem_to_hbm [thread:$0]  (%p1709_p5), %s1210_s18, 128, %s1207_s23, %s1196_s19  }
 0x88e PF: > { %s1938_s16 = sld [smem:[#allocation9_spill]] }
 0x88f   : > { %s1939_s26 = sld [smem:[#allocation7_spill]] }
 0x894   : > { %p1436_p0 = scmp.ge.s32.totalorder %s1938_s16, 2 }
 0x895   : > { %s1221_s0 = sand.u32 1, %s1939_s26  }
 0x896   : > { %p1433_p1 = pnand %p1436_p0, %p1713_p6  ;;  %s1222_s21 = scalar_lea.sflag [#allocation5], %s1221_s0 }
 0x898   : > { %p1434_p2 = pneg %p1433_p1 }
 0x89a   : > { %1548 = dma.done.wait (%p1434_p2), %s1222_s21, 128  }
 0x89b   : > { %1550 = vsyncadd (%p1434_p2), %s1222_s21, 4294967168  ;;  %s1941_s30 = sld [smem:[#allocation10_spill]]  ;;  %s1944_s27 = smov %s1557_s28 }
 0x89c   : > { %s1942_s17 = sld [smem:[#allocation8_spill]] }
 0x89d   : > { %s1943_s29 = sld [smem:[#allocation11_spill]] }
 0x8a1   : > { %p28_p3 = scmp.ge.s32.totalorder %s1941_s30, 4  }
 0x8a2   : > { %s1945_s28 = smov %s1942_s17 }
 0x8a3   :  { %30 = sbr.rel (!%p28_p3) target bundleno = 10 (0xa), region = 155 }
 0x8a8   :  { %1227 = vsyncpa [#allocation5], 1 }
 0x8a9   :  { %1229 = vsyncpa [#allocation5 + $0x1], 1 }

// kernel: tpu_custom_call.1
= control target key start
LH: loop header
LB: loop body
LE: loop exit
PB: predicated region body
PF: predicated region fallthrough
CT: control target
= control target key end

     0   :  { %s1888_s0 = inlined_call_operand.vmem [shape: f32[2,8,32], index: 0, kind: input, shape index: {}]   ;;  %s1889_s1 = inlined_call_operand.vmem [shape: f32[2,8,8], index: 1, kind: input, shape index: {}]   ;;  %s1890_s2 = inlined_call_operand.vmem [shape: bf16[4,32,8], index: 2, kind: input, shape index: {}]   ;;  %s1891_s3 = inlined_call_operand.vmem [shape: f32[4,1,8], index: 3, kind: input, shape index: {}]   ;;  %s1892_s4 = inlined_call_operand.vmem [shape: bf16[4,32,8], index: 4, kind: input, shape index: {}]   ;;  %s1893_s5 = inlined_call_operand.vmem [shape: f32[4,1,8], index: 5, kind: input, shape index: {}]   ;;  %s1894_s6 = inlined_call_operand.vmem [shape: bf16[4,32,8], index: 6, kind: input, shape index: {}]   ;;  %s1895_s7 = inlined_call_operand.vmem [shape: f32[4,1,8], index: 7, kind: input, shape index: {}]   ;;  %s1896_s8 = inlined_call_operand.vmem [shape: bf16[4,8,32], index: 8, kind: input, shape index: {}]   ;;  %s1897_s9 = inlined_call_operand.vmem [shape: f32[1,32], index: 9, kind: input, shape index: {}]   ;;  %s1898_s10 = inlined_call_operand.vmem [shape: bf16[32,64], index: 10, kind: input, shape index: {}]   ;;  %s1899_s11 = inlined_call_operand.vmem [shape: f32[1,64], index: 11, kind: input, shape index: {}]   ;;  %s1900_s12 = inlined_call_operand.vmem [shape: bf16[64,32], index: 12, kind: input, shape index: {}]   ;;  %s1901_s13 = inlined_call_operand.vmem [shape: f32[1,32], index: 13, kind: input, shape index: {}]   ;;  %s1902_s14 = inlined_call_operand.vmem [shape: f32[1,32], index: 14, kind: input, shape index: {}]   ;;  %s1903_s15 = inlined_call_operand.vmem [shape: f32[1,32], index: 15, kind: input, shape index: {}]   ;;  %s1904_s16 = inlined_call_operand.vmem [shape: f32[1,32], index: 16, kind: input, shape index: {}]   ;;  %s1905_s17 = inlined_call_operand.vmem [shape: f32[1,32], index: 17, kind: input, shape index: {}]   ;;  %s1906_s18 = inlined_call_operand.hbm [shape: f32[2,8,32], index: 18, kind: output, shape index: {}]  }
   0x1   :  { %1915 = sst [smem:[#allocation13_spill]] %s1888_s0 }
   0x2   :  { %1916 = sst [smem:[#allocation14_spill]] %s1889_s1 }
   0x3   :  { %1917 = sst [smem:[#allocation15_spill]] %s1890_s2 }
   0x4   :  { %1918 = sst [smem:[#allocation16_spill]] %s1904_s16 }
   0x5   :  { %1919 = sst [smem:[#allocation17_spill]] %s1905_s17 }
   0x6   :  { %1920 = sst [smem:[#allocation18_spill]] %s1906_s18 }
   0x7   :  { %23 = vsyncpa [#allocation5], 0 }
   0x8   :  { %25 = vsyncpa [#allocation5 + $0x1], 0  ;;  %s1671_s27 = smov 0   ;;  %s1673_s28 = smov 0  }
   0x9   :  { %s1675_s29 = smov 0   ;;  %s1677_s30 = smov 0  }
   0xa LB: > { %1921 = sst [smem:[#allocation7_spill]] %s1553_s27  ;;  %s1692_s0 = sadd.s32 4294967295, %s1565_s30   ;;  %s1565_s30 = sphi %s1677_s30, %s1941_s30   ;;  %s1561_s29 = sphi %s1675_s29, %s1943_s29   ;;  %s1557_s28 = sphi %s1673_s28, %s1945_s28   ;;  %s1553_s27 = sphi %s1671_s27, %s1944_s27  }
   0xb   : > { %1922 = sst [smem:[#allocation8_spill]] %s1561_s29  ;;  %s1296_s19 = sadd.s32 4294967294, %s1565_s30  }
   0xc   : > { %1923 = sst [smem:[#allocation9_spill]] %s1565_s30  ;;  %s1696_s1 = sadd.s32 1, %s1565_s30  }
   0xd   : > { %1924 = sst [smem:[#allocation10_spill]] %s1696_s1  ;;  %s426_s20 = sadd.s32 1, %s1561_s29 }
   0xe   : > { %s423_s21 = ssub.s32 %s1565_s30, %s1696_s1  ;;  %p436_p0 = scmp.ne.s32.totalorder %s1561_s29, %s1557_s28 }
   0xf   : > { %p424_p1 = scmp.eq.s32.totalorder %s423_s21, 0  ;;  %p437_p2 = scmp.eq.s32.totalorder %s1692_s0, 1 }
  0x10   : > { %p442_p3 = scmp.ne.s32.totalorder %s1557_s28, %s1553_s27  ;;  %p443_p4 = scmp.eq.s32.totalorder %s1296_s19, 1 }
  0x11   : > { %s1707_s22 = scalar_select %p424_p1, %s1561_s29, %s426_s20  }
  0x12   : > { %p1709_p5 = por %p437_p2, %p436_p0  ;;  %p1713_p6 = por %p443_p4, %p442_p3 }
  0x13   : > { %1925 = sst [smem:[#allocation11_spill]] %s1707_s22  ;;  %p1299_p7 = scmp.ge.s32.totalorder %s1565_s30, 1 }
  0x14   : > { %s1927_s23 = scalar_select %p1713_p6, 1, 0 }
  0x15   : > { %p523_p8 = scmp.lt.s32.totalorder %s1565_s30, 3 }
  0x16   : > { %1928 = sst [smem:[#allocation12_spill]] %s1927_s23 }
  0x17   : > { %p524_p9 = pnand %p1299_p7, %p523_p8 }
  0x18   : > { %s1913_s24 = sand.u32 (!%p524_p9), 1, %s1557_s28   ;;  %p580_p10 = scmp.lt.s32.totalorder (!%p524_p9), %s1692_s0, 1 }
  0x19   : > { %527 = sbr.rel (%p524_p9) target bundleno = 2190 (0x88e), region = 92  ;;  %s1723_s25 = sshll.u32 (!%p524_p9), %s1913_s24, 3 }
  0x1a   : > { %s1929_s22 = sld [smem:[#allocation13_spill]] (!%p524_p9)  ;;  %s1740_s18 = smov (!%p524_p9), 0  }
  0x1b   : > { %s1930_s27 = sld [smem:[#allocation14_spill]] (!%p524_p9) }
  0x1e   : > { %vm593_vm0 = vcmask 261120   ;;  %v1571_v0 = vmov 0.0   ;;  %s581_s26 = scalar_select %p580_p10, %s1692_s0, 1  ;;  %vm591_vm1 = vcmask 257024  }
  0x1f   : > { %594 = vst.msk [vmem:[#allocation3] sm:$0xff] %vm593_vm0, %v1571_v0 }
  0x20   : > { %s1301_s19 = sshll.u32 %s581_s26, 3 }
  0x21   : > { %s1731_s29 = scalar_lea.vmem %s1929_s22, %s1301_s19  ;;  %s1736_s30 = scalar_lea.vmem %s1930_s27, %s1301_s19 }
  0x22   : > { %v589_v1 = vld [vmem:[%s1731_s29] sm:$0xff] }
  0x23   : > { %v590_v2 = vpack.c.bf16 %v589_v1, %v589_v1 }
  0x25   : > { %592 = vst.msk [vmem:[#allocation2] sm:$0xf] %vm591_vm1, %v590_v2 }
  0x26 LB: >> { %v1572_v3 = vmov 0.0   ;;  %s1342_s1 = sshll.u32 %s1569_s18, 4  ;;  %vm1573_vm2 = vmmov 0   ;;  %s1931_s20 = sld [smem:[#allocation15_spill]]  ;;  %vm808_vm3 = vcmask 64512   ;;  %v855_v27 = vld [vmem:[%s1736_s30] sm:$0xff]  ;;  %s1569_s18 = sphi %s1740_s18, %s600_s18  }
  0x27   : >> { %1376 = vmatprep.subr.bf16.mxu1 %v1572_v3  ;;  %1368 = vmatprep.subr.bf16.mxu0 %v1572_v3  ;;  %s674_s23 = scalar_lea.vmem %s1892_s4, %s1342_s1  ;;  %s1757_s16 = scalar_lea.vmem %s1894_s6, %s1342_s1  ;;  %vm856_vm4 = vcmp.gt.f32.partialorder %v855_v27, 0.0  ;;  %vm874_vm5 = vcmask 1043456   ;;  %v918_v58 = vld [vmem:[#allocation3] sm:$0xff] }
  0x28   : >> { %1380 = vmatprep.mubr.msk.bf16.mxu1 %vm1573_vm2, %v1572_v3  ;;  %1372 = vmatprep.mubr.msk.bf16.mxu0 %vm1573_vm2, %v1572_v3  ;;  %v1481_v4 = vld [vmem:[%s674_s23 + $0x8] sm:$0xff]   ;;  %v1483_v6 = vld [vmem:[%s674_s23] sm:$0xff]   ;;  %s609_s23 = scalar_lea.vmem %s1891_s3, %s1569_s18  ;;  %s745_s19 = scalar_lea.vmem %s1895_s7, %s1569_s18 }
  0x29   : >> { %1377 = vmatpush3.bf16.msra.mxu1 %v1481_v4  ;;  %v1305_v10 = vld [vmem:[%s609_s23] ss:$0 sm:$0xff]  ;;  %v1485_v25 = vld [vmem:[%s1757_s16 + $0x8] sm:$0xff]  }
  0x2a   : >> { %1378 = vmatprep.subr.bf16.mxu1 %v1572_v3  ;;  %v1486_v26 = vld [vmem:[%s1757_s16] sm:$0xff]  }
  0x2b   : >> { %v1315_v40 = vld [vmem:[%s745_s19] ss:$0 sm:$0xff] }
  0x2c   : >> { %s604_s21 = scalar_lea.vmem %s1931_s20, %s1342_s1  ;;  %v601_v8 = vld [vmem:[#allocation2] sm:$0xf]  ;;  %s679_s1 = scalar_lea.vmem %s1893_s5, %s1569_s18 }
  0x2d   : >> { %v1482_v5 = vld [vmem:[%s604_s21 + $0x8] sm:$0xff]   ;;  %v1484_v7 = vld [vmem:[%s604_s21] sm:$0xff]   ;;  %1379 = vmatpush3.bf16.msra.mxu1 %v1483_v6  ;;  %s1321_s20 = sshll.u32 %s1569_s18, 2  ;;  %s600_s18 = sadd.s32 1, %s1569_s18  }
  0x2e   : >> { %1369 = vmatpush3.bf16.msra.mxu0 %v1482_v5  ;;  %1392 = vmatprep.subr.bf16.mxu1 %v1572_v3  ;;  %v1310_v9 = vld [vmem:[%s679_s1] ss:$0 sm:$0xff]  ;;  %s921_s24 = scalar_lea.vmem %s1896_s8, %s1321_s20  ;;  %p597_p11 = scmp.ge.s32.totalorder %s600_s18, 4  }
  0x2f   : >> { %1370 = vmatprep.subr.bf16.mxu0 %v1572_v3  ;;  %v922_v47 = vld [vmem:[%s921_s24] sm:$0xf]  ;;  %vm1574_vm6 = vmmov (%p597_p11), 0   ;;  %vm1120_vm7 = vcmask (%p597_p11), 523264   ;;  %s1932_s20 = sld [smem:[#allocation16_spill]] (%p597_p11)  ;;  %s1339_s1 = sshll.u32 (%p597_p11), %s1692_s0, 7 }
  0x30   : >> { %1381 = vmatmul.mubr.msk.bf16.vlgmr.msra.gmra.mxu1 %vm593_vm0, %v601_v8  ;;  %v927_v48 = vsel %vm874_vm5, %v922_v47, 0  ;;  %v971_v1 = vld [vmem:[%s1731_s29] sm:$0xff] (%p597_p11)  ;;  %s1933_s24 = sld [smem:[#allocation17_spill]] (%p597_p11)  ;;  %s1934_s27 = scalar_lea.vmem (%p597_p11), [#allocation4], %s1723_s25 }
  0x31   : >> { %1394 = vmatprep.mubr.msk.bf16.mxu1 %vm1573_vm2, %v1572_v3  ;;  %v1496_v27 = vld [vmem:[%s1900_s12] sm:$0xff] (%p597_p11)   ;;  %s1209_s18 = sshll.u32 (%p597_p11), %s1934_s27, 4  ;;  %s1935_s22 = sld [smem:[#allocation18_spill]] (%p597_p11)  ;;  %s1210_s18 = int_to_ptr.vmem [resolvable:$true] %s1209_s18 }
  0x32   : >> { %1371 = vmatpush3.bf16.msra.mxu0 %v1484_v7  ;;  %s1936_s16 = smov (%p597_p11), %s1934_s27  ;;  %s1937_s26 = sand.u32 (%p597_p11), 1, %s1557_s28  }
  0x33   : >> { %1384 = vmatprep.subr.bf16.mxu0 %v1572_v3  ;;  %s1196_s19 = scalar_lea.sflag (%p597_p11), [#allocation5], %s1937_s26  ;;  %s1575_s0 = smov (%p597_p11), [#allocation4]  }
  0x34   : > { %s1505_s21 = sshll.u32 (%p597_p11), %s1575_s0, 4  ;;  %s1506_s21 = int_to_ptr.vmem [resolvable:$false] %s1505_s21 }
  0x35   : >> { %1373 = vmatmul.mubr.msk.bf16.vlgmr.msra.gmra.mxu0 %vm593_vm0, %v601_v8  ;;  %s1507_s17 = scalar_lea.vmem (%p597_p11), %s1506_s21, 256  ;;  %p1508_p1 = scmp.lt.s32.totalorder (%p597_p11), %s1210_s18, %s1506_s21 }
  0x36   : >> { %1388 = vmatprep.mubr.msk.bf16.mxu0 %vm1573_vm2, %v1572_v3  ;;  %1385 = vmatpush3.bf16.msra.mxu0 %v1485_v25 }
  0x37   : >> { %1386 = vmatprep.subr.bf16.mxu0 %v1572_v3  ;;  %s1207_s23 = scalar_lea.hbm (%p597_p11), %s1935_s22, %s1339_s1 }
  0x3a   : >> { %1387 = vmatpush3.bf16.msra.mxu0 %v1486_v26  ;;  %v1495_v26 = vld [vmem:[%s1900_s12 + $0x8] sm:$0xff] (%p597_p11)  }
  0x3b   : >> { %1398 = vmatprep.subr.bf16.mxu0 %v1572_v3 }
  0x3d   : >> { %1389 = vmatmul.mubr.msk.bf16.vlgmr.msra.gmra.mxu0 %vm593_vm0, %v601_v8 }
  0x3e   : >> { %1400 = vmatprep.mubr.msk.bf16.mxu0 %vm1573_vm2, %v1572_v3 }
  0xf0   : >> { %v733_v11 = vpop.f32.mrf.mxu1 }
  0xf1   : >> { %v734_v12 = vadd.f32 %v1310_v9, %v733_v11 }
  0xf2   : >> { %v1382_v15 = vpop.f32.mrf.mxu1 }
  0xf3   : >> { %v806_v16 = vpack.c.bf16 %v734_v12, %v734_v12  ;;  %v1491_v12 = vld [vmem:[%s1898_s10 + $0x8] sm:$0xff] (%p597_p11)   ;;  %v1494_v15 = vld [vmem:[%s1900_s12 + $0x10] sm:$0xff] (%p597_p11)  }
  0xf4   : >> { %v736_v18 = vpop.f32.mrf.mxu1 }
  0xf5   : >> { %v666_v13 = vpop.f32.mrf.mxu0  ;;  %v813_v19 = vsel %vm808_vm3, %v806_v16, 0 }
  0xf6   : >> { %v667_v14 = vadd.f32 %v1305_v10, %v666_v13  ;;  %v1383_v22 = vpop.f32.mrf.mxu1  ;;  %1393 = vmatpush3.bf16.xpose.msra.mxu1 %v813_v19  ;;  %v1492_v13 = vld [vmem:[%s1898_s10] sm:$0xff] (%p597_p11)  }
  0xf7   : >> { %v1374_v17 = vpop.f32.mrf.mxu0  ;;  %1404 = vmatprep.subr.bf16.mxu1 %v1572_v3  ;;  %v1325_v22 = vld [vmem:[%s1903_s15] ss:$0 sm:$0xff] (%p597_p11) }
  0xf8   : >> { %v672_v20 = vmul.f32 0.35355338, %v667_v14  ;;  %v1493_v14 = vld [vmem:[%s1900_s12 + $0x18] sm:$0xff] (%p597_p11)  }
  0xf9   : >> { %v669_v21 = vpop.f32.mrf.mxu0 }
  0xfa   : >> { %v805_v24 = vpack.c.bf16 %v672_v20, %v672_v20  ;;  %v1324_v20 = vld [vmem:[%s1902_s14] ss:$0 sm:$0xff] (%p597_p11) }
  0xfb   : >> { %v1375_v23 = vpop.f32.mrf.mxu0 }
  0xfd   : >> { %1395 = vmatmul.mubr.msk.bf16.vlgmr.msra.gmra.mxu1 %vm808_vm3, %v805_v24  ;;  %v799_v39 = vpop.f32.mrf.mxu0 }
  0xfe   : >> { %1406 = vmatprep.mubr.msk.bf16.mxu1 %vm1573_vm2, %v1572_v3  ;;  %v800_v41 = vadd.f32 %v1315_v40, %v799_v39  ;;  %1405 = vmatpush3.bf16.msra.mxu1 %v927_v48  ;;  %v1323_v3 = vld [vmem:[%s1897_s9] ss:$0 sm:$0xff] (%p597_p11) }
  0xff   : >> { %v1390_v42 = vpop.f32.mrf.mxu0  ;;  %1418 = vmatprep.subr.bf16.mxu1 (%p597_p11), %v1571_v0 }
 0x100   : >> { %v807_v43 = vpack.c.bf16 %v800_v41, %v800_v41 }
 0x101   : >> { %v802_v44 = vpop.f32.mrf.mxu0 }
 0x102   : >> { %v876_v45 = vsel %vm874_vm5, %v807_v43, 0 }
 0x103   : >> { %v1391_v46 = vpop.f32.mrf.mxu0  ;;  %1399 = vmatpush3.bf16.msra.mxu0 %v876_v45 }
 0x104   : > { %1410 = vmatprep.subr.bf16.mxu0 (%p597_p11), %v1571_v0 }
 0x1bd   : >> { %v849_v28 = vpop.f32.mrf.mxu1 }
 0x1be   : >> { %v857_v29 = vsel %vm856_vm4, %v849_v28, -1e+09  ;;  %v1326_v28 = vld [vmem:[%s1899_s11] ss:$0 sm:$0xff] (%p597_p11) }
 0x1bf   : >> { %v1396_v30 = vpop.f32.mrf.mxu1  ;;  %v858_v31 = vsel %vm808_vm3, %v857_v29, -inf }
 0x1c0   : >> { %859 = vmax.xlane.f32.xlu0 %v858_v31 }
 0x1c1   : >> { %v852_v32 = vpop.f32.mrf.mxu1 }
 0x1c3   : >> { %v1397_v33 = vpop.f32.mrf.mxu1 }
 0x249   : >> { %v860_v34 = vpop.xlane.xlu0 %859 }
 0x24a   : >> { %v861_v35 = vsub.f32 %v857_v29, %v860_v34 }
 0x24c   : >> { %v862_v36 = vmul.f32 1.442695, %v861_v35 }
 0x24e   : >> { %1487 = vpow2.f32 %v862_v36 }
 0x25b   : >> { %v1488_v37 = vpop.eup %1487 }
 0x25c   : >> { %v864_v38 = vsel %vm808_vm3, %v1488_v37, 0.0 }
 0x25d   : >> { %865 = vadd.xlane.f32.xlu0 %v864_v38 }
 0x2e6   : >> { %v866_v49 = vpop.xlane.xlu0 %865 }
 0x2e7   : >> { %1489 = vrcp.f32 %v866_v49 }
 0x2f4   : >> { %v1490_v50 = vpop.eup %1489 }
 0x2f5   : >> { %v869_v51 = vmul.f32 %v1490_v50, %v1488_v37 }
 0x2f7   : >> { %v870_v52 = vpack.c.bf16 %v869_v51, %v869_v51 }
 0x2f9   : >> { %1401 = vmatmul.mubr.msk.bf16.vlgmr.msra.gmra.mxu0 %vm808_vm3, %v870_v52  ;;  %v1336_v52 = vld [vmem:[%s1932_s20] ss:$0 sm:$0xff] (%p597_p11)  ;;  %s1501_s20 = scalar_lea.vmem (%p597_p11), %s1210_s18, 128 }
 0x2fa   : > { %1414 = vmatprep.mubr.msk.bf16.mxu0 (%p597_p11), %vm1574_vm6, %v1571_v0  ;;  %1411 = vmatpush3.bf16.msra.mxu0 (%p597_p11), %v1491_v12  ;;  %p1502_p12 = scmp.ne.s32.totalorder (%p597_p11), %s1210_s18, %s1501_s20  ;;  %p1509_p2 = scmp.lt.s32.totalorder (%p597_p11), %s1507_s17, %s1501_s20 }
 0x2fb   : > { %1412 = vmatprep.subr.bf16.mxu0 (%p597_p11), %v1571_v0 }
 0x2fc   : > { %p1503_p13 = pnand (%p597_p11), %p1502_p12, %p1709_p5  ;;  %p1510_p3 = por (%p597_p11), %p1509_p2, %p1508_p1 }
 0x2fe   : > { %1413 = vmatpush3.bf16.msra.mxu0 (%p597_p11), %v1492_v13  ;;  %p1504_p0 = pneg (%p597_p11), %p1503_p13 }
 0x300   : > { %p1511_p4 = pnand (%p597_p11), %p1510_p3, %p1504_p0 }
 0x3b9   : >> { %v912_v53 = vpop.f32.mrf.mxu0 }
 0x3ba   : >> { %v919_v54 = vpack.c.bf16 %v912_v53, %v912_v53 }
 0x3bb   : >> { %v1402_v55 = vpop.f32.mrf.mxu0 }
 0x3bc   : >> { %1407 = vmatmul.mubr.msk.bf16.vlgmr.msra.gmra.mxu1 %vm808_vm3, %v919_v54  ;;  %v1337_v54 = vld [vmem:[%s1933_s24] ss:$0 sm:$0xff] (%p597_p11) }
 0x3bd   : >> { %v915_v56 = vpop.f32.mrf.mxu0  ;;  %1426 = vmatprep.mubr.msk.bf16.mxu1 (%p597_p11), %vm1574_vm6, %v1571_v0  ;;  %1419 = vmatpush3.bf16.msra.mxu1 (%p597_p11), %v1493_v14 }
 0x3be   : > { %1420 = vmatprep.subr.bf16.mxu1 (%p597_p11), %v1571_v0 }
 0x3bf   : >> { %v1403_v57 = vpop.f32.mrf.mxu0 }
 0x3c1   : > { %1421 = vmatpush3.bf16.msra.mxu1 (%p597_p11), %v1494_v15 }
 0x3c2   : > { %1422 = vmatprep.subr.bf16.mxu1 (%p597_p11), %v1571_v0 }
 0x3c5   : > { %1423 = vmatpush3.bf16.msra.mxu1 (%p597_p11), %v1495_v26 }
 0x3c6   : > { %1424 = vmatprep.subr.bf16.mxu1 (%p597_p11), %v1571_v0  ;;  %v1330_v0 = vld [vmem:[%s1901_s13] ss:$0 sm:$0xff] (%p597_p11) }
 0x3c9   : > { %1425 = vmatpush3.bf16.msra.mxu1 (%p597_p11), %v1496_v27 }
 0x47c   : >> { %v963_v59 = vpop.f32.mrf.mxu1 }
 0x47d   : >> { %v969_v60 = vadd.f32 %v963_v59, %v918_v58 }
 0x47e   : >> { %v1408_v61 = vpop.f32.mrf.mxu1 }
 0x47f   : >> { %970 = vst.msk [vmem:[#allocation3] sm:$0xff] %vm593_vm0, %v969_v60 }
 0x480   : >> { %v966_v62 = vpop.f32.mrf.mxu1 }
 0x482   : >> { %v1409_v63 = vpop.f32.mrf.mxu1 }
 0x483   : > { %599 = sbr.rel (!%p597_p11) target bundleno = 38 (0x26), region = 144 }
 0x486   : > { %v972_v2 = vld [vmem:[#allocation3] sm:$0xff] (%p597_p11) }
 0x487   : > { %v980_v4 = vadd.f32 (%p597_p11), %v1323_v3, %v972_v2 }
 0x489   : > { %v981_v5 = vadd.f32 %v980_v4, %v971_v1 }
 0x48b   : > { %v984_v6 = vsel %vm593_vm0, %v981_v5, 0.0 }
 0x48c   : > { %985 = vadd.xlane.f32.xlu0 %v984_v6 }
 0x515   : > { %v986_v7 = vpop.xlane.xlu0 %985 }
 0x516   : > { %v988_v8 = vmul.f32 0.03125, %v986_v7 }
 0x518   : > { %v989_v9 = vsub.f32 %v981_v5, %v988_v8 }
 0x51a   : > { %v990_v10 = vmul.f32 %v989_v9, %v989_v9 }
 0x51c   : > { %v991_v11 = vsel %vm593_vm0, %v990_v10, 0.0 }
 0x51d   : > { %992 = vadd.xlane.f32.xlu0 %v991_v11 }
 0x5a6   : > { %v993_v16 = vpop.xlane.xlu0 %992 }
 0x5a7   : > { %v994_v17 = vmul.f32 0.03125, %v993_v16 }
 0x5a9   : > { %v995_v18 = vadd.f32 1e-05, %v994_v17 }
 0x5ab   : > { %1497 = vrsqrt.f32 %v995_v18 }
 0x5b8   : > { %v1498_v19 = vpop.eup %1497 }
 0x5b9   : > { %v997_v21 = vmul.f32 %v1498_v19, %v989_v9 }
 0x5bb   : > { %v1004_v23 = vmul.f32 %v1324_v20, %v997_v21 }
 0x5bd   : > { %v1011_v24 = vadd.f32 %v1325_v22, %v1004_v23 }
 0x5bf   : > { %v1012_v25 = vpack.c.bf16 %v1011_v24, %v1011_v24 }
 0x5c1   : > { %1415 = vmatmul.mubr.msk.bf16.vlgmr.msra.gmra.mxu0 %vm593_vm0, %v1012_v25 }
 0x681   : > { %v1073_v29 = vpop.f32.mrf.mxu0 }
 0x682   : > { %v1074_v30 = vadd.f32 %v1326_v28, %v1073_v29 }
 0x683   : > { %v1416_v31 = vpop.f32.mrf.mxu0 }
 0x684   : > { %v1079_v32 = vmax.f32 %v1074_v30, 0.0 }
 0x685   : > { %v1076_v33 = vpop.f32.mrf.mxu0 }
 0x686   : > { %v1080_v34 = vpack.c.bf16 %v1079_v32, %v1079_v32 }
 0x687   : > { %v1417_v35 = vpop.f32.mrf.mxu0 }
 0x688   : > { %1427 = vmatmul.mubr.msk.bf16.vlgmr.msra.gmra.mxu1 %vm1120_vm7, %v1080_v34 }
 0x748   : > { %v1158_v36 = vpop.f32.mrf.mxu1 }
 0x749   : > { %v1159_v37 = vadd.f32 %v1330_v0, %v1158_v36 }
 0x74a   : > { %v1428_v38 = vpop.f32.mrf.mxu1 }
 0x74b   : > { %v1164_v39 = vadd.f32 %v1159_v37, %v1011_v24 }
 0x74c   : > { %v1161_v40 = vpop.f32.mrf.mxu1 }
 0x74d   : > { %v1167_v41 = vsel %vm593_vm0, %v1164_v39, 0.0 }
 0x74e   : > { %1168 = vadd.xlane.f32.xlu1 %v1167_v41  ;;  %v1429_v42 = vpop.f32.mrf.mxu1 }
 0x7d7   : > { %v1169_v43 = vpop.xlane.xlu1 %1168 }
 0x7d8   : > { %v1170_v44 = vmul.f32 0.03125, %v1169_v43 }
 0x7da   : > { %v1171_v45 = vsub.f32 %v1164_v39, %v1170_v44 }
 0x7dc   : > { %v1172_v46 = vmul.f32 %v1171_v45, %v1171_v45 }
 0x7de   : > { %v1173_v47 = vsel %vm593_vm0, %v1172_v46, 0.0 }
 0x7df   : > { %1174 = vadd.xlane.f32.xlu1 %v1173_v47 }
 0x868   : > { %v1175_v48 = vpop.xlane.xlu1 %1174 }
 0x869   : > { %v1176_v49 = vmul.f32 0.03125, %v1175_v48 }
 0x86b   : > { %v1177_v50 = vadd.f32 1e-05, %v1176_v49 }
 0x86d   : > { %1499 = vrsqrt.f32 %v1177_v50 }
 0x87a   : > { %v1500_v51 = vpop.eup %1499 }
 0x87b   : > { %v1179_v53 = vmul.f32 %v1500_v51, %v1171_v45 }
 0x87d   : > { %v1186_v55 = vmul.f32 %v1336_v52, %v1179_v53 }
 0x87f   : > { %v1193_v56 = vadd.f32 %v1337_v54, %v1186_v55 }
 0x881   : > { %1194 = vst.msk [vmem:[%s1936_s16] sm:$0xff] %vm593_vm0, %v1193_v56 }
 0x882   : > { %1514 = shalt.err (!%p1511_p4)
}
 0x883   : > { %s1515_s24 = scalar_lea.hbm %s1207_s23, 128  ;;  %s1519_s27 = scalar_lea.hbm %s1935_s22, 256 }
 0x884   : > { %p1516_p7 = scmp.ne.s32.totalorder %s1207_s23, %s1515_s24  ;;  %p1520_p10 = scmp.lt.s32.totalorder %s1207_s23, %s1935_s22 }
 0x885   : > { %p1521_p11 = scmp.lt.s32.totalorder %s1519_s27, %s1515_s24 }
 0x886   : > { %p1517_p8 = pnand %p1516_p7, %p1709_p5 }
 0x887   : > { %p1522_p12 = por %p1521_p11, %p1520_p10 }
 0x888   : > { %p1518_p9 = pneg %p1517_p8 }
 0x88a   : > { %p1523_p13 = pnand %p1522_p12, %p1518_p9 }
 0x88c   : > { %1526 = shalt.err (!%p1523_p13)
}
 0x88d   : > { %1430 = dma.vmem_to_hbm [thread:$0]  (%p1709_p5), %s1210_s18, 128, %s1207_s23, %s1196_s19  }
 0x88e PF: > { %s1938_s16 = sld [smem:[#allocation9_spill]] }
 0x88f   : > { %s1939_s26 = sld [smem:[#allocation7_spill]] }
 0x894   : > { %p1436_p0 = scmp.ge.s32.totalorder %s1938_s16, 2 }
 0x895   : > { %s1221_s0 = sand.u32 1, %s1939_s26  }
 0x896   : > { %p1433_p1 = pnand %p1436_p0, %p1713_p6  ;;  %s1222_s21 = scalar_lea.sflag [#allocation5], %s1221_s0 }
 0x898   : > { %p1434_p2 = pneg %p1433_p1 }
 0x89a   : > { %1548 = dma.done.wait (%p1434_p2), %s1222_s21, 128  }
 0x89b   : > { %1550 = vsyncadd (%p1434_p2), %s1222_s21, 4294967168  ;;  %s1941_s30 = sld [smem:[#allocation10_spill]]  ;;  %s1944_s27 = smov %s1557_s28 }
 0x89c   : > { %s1942_s17 = sld [smem:[#allocation8_spill]] }
 0x89d   : > { %s1943_s29 = sld [smem:[#allocation11_spill]] }
 0x8a1   : > { %p28_p3 = scmp.ge.s32.totalorder %s1941_s30, 4  }
 0x8a2   : > { %s1945_s28 = smov %s1942_s17 }
 0x8a3   :  { %30 = sbr.rel (!%p28_p3) target bundleno = 10 (0xa), region = 155 }
 0x8a8   :  { %1227 = vsyncpa [#allocation5], 1 }
 0x8a9   :  { %1229 = vsyncpa [#allocation5 + $0x1], 1 }

</bundles_post_ra>
